<compile_context>
chip_gen: v5e
topology: v5e:2x2
jax: 0.10.0
libtpu: 0.0.40
codegen_flags: <defaults>
</compile_context>

<pallas_src>
import functools

import jax
import jax.numpy as jnp
from jax.experimental import pallas as pl
from jax.experimental.pallas import tpu as pltpu

_LANE = 128   # node dim and channel dims are padded to multiples of this


def _round_up(v, m):
    return (v + m - 1) // m * m


def _vmem_budget_bytes():
    """Generation-aware VMEM budget: physical VMEM minus ~16 MiB headroom."""
    phys = 128 * 1024 * 1024
    try:
        info = pltpu.get_tpu_info()
        phys = int(getattr(info, "vmem_capacity_bytes", phys))
    except Exception:
        pass
    return max(32 * 1024 * 1024, phys - 16 * 1024 * 1024)


# ----------------------------------------------------------------------------
# Fused whole-stack kernel (single VMEM block, no grid) — small/medium graphs.
# ----------------------------------------------------------------------------
def _graphsage_fused_kernel(*refs, layer_meta, compute_dtype):
    """refs = (adj, x, w_cat_0, b_0, ..., w_cat_{L-1}, b_{L-1}, out).

    adj     : (N_pad, N_pad) compute_dtype row-normalized adjacency
    x       : (N_pad, c0_pad) compute_dtype node features
    w_cat_l : (ci_pad, 2*co_pad) compute_dtype, [:, :co_pad]=W_l, [:, co_pad:]=W_r
    b_l     : (1, co_pad) f32
    out     : (N_pad, c_last_pad) f32
    """
    num_layers = len(layer_meta)
    adj_ref, x_ref = refs[0], refs[1]
    wb = refs[2:2 + 2 * num_layers]
    o_ref = refs[2 + 2 * num_layers]

    adj = adj_ref[...]          # already in compute dtype (no O(N^2) cast copy)
    h = x_ref[...]              # compute dtype

    for l, (ci_pad, co_pad, proj_first, apply_act) in enumerate(layer_meta):
        w_cat = wb[2 * l][...]          # compute dtype
        b = wb[2 * l + 1][...]          # f32
        h_c = h.astype(compute_dtype)

        if proj_first:
            # z = h @ [W_l | W_r] in one MXU pass, then A @ z_l (narrow RHS).
            z = jnp.dot(h_c, w_cat, preferred_element_type=jnp.float32)
            z_l = z[:, :co_pad].astype(compute_dtype)
            z_r = z[:, co_pad:]
            agg = jnp.dot(adj, z_l, preferred_element_type=jnp.float32)
            out = agg + z_r + b
        else:
            # Aggregate first (cheaper when C_in < C_out).
            agg_h = jnp.dot(adj, h_c, preferred_element_type=jnp.float32)
            out = (jnp.dot(agg_h.astype(compute_dtype), w_cat[:, :co_pad],
                           preferred_element_type=jnp.float32)
                   + jnp.dot(h_c, w_cat[:, co_pad:],
                             preferred_element_type=jnp.float32)
                   + b)

        if apply_act:
            out = jnp.where(out > 0, out, 0.1 * out)   # LeakyReLU(0.1), f32
        h = out                                        # f32 between layers

    o_ref[...] = h.astype(o_ref.dtype)


def _fused_call(adj_p, x_p, packed, layer_meta, n_pad, compute_dtype, vmem_limit):
    inputs = [adj_p, x_p] + list(packed)
    c_last_pad = layer_meta[-1][1]

    flops = 0
    for (ci, co, proj_first, _) in layer_meta:
        flops += 2 * n_pad * ci * (2 * co)                       # projection(s)
        flops += 2 * n_pad * n_pad * (co if proj_first else ci)  # aggregation
    bytes_accessed = (sum(int(a.size) * a.dtype.itemsize for a in inputs)
                      + n_pad * c_last_pad * 4)

    kernel = functools.partial(_graphsage_fused_kernel,
                               layer_meta=layer_meta,
                               compute_dtype=compute_dtype)
    return pl.pallas_call(
        kernel,
        out_shape=jax.ShapeDtypeStruct((n_pad, c_last_pad), jnp.float32),
        in_specs=[pl.BlockSpec(a.shape, lambda: (0, 0)) for a in inputs],
        out_specs=pl.BlockSpec((n_pad, c_last_pad), lambda: (0, 0)),
        compiler_params=pltpu.CompilerParams(vmem_limit_bytes=int(vmem_limit)),
        cost_estimate=pl.CostEstimate(flops=int(flops), transcendentals=0,
                                      bytes_accessed=int(bytes_accessed)),
    )(*inputs)


# ----------------------------------------------------------------------------
# Tiled per-layer path — large graphs that don't fit the single-block budget.
# ----------------------------------------------------------------------------
def _project_kernel(h_ref, w_ref, z_ref):
    # z = h @ [W_l | W_r], row-tiled ("parallel").
    z_ref[...] = jnp.dot(h_ref[...], w_ref[...],
                         preferred_element_type=jnp.float32).astype(z_ref.dtype)


def _aggregate_kernel(adj_ref, zl_ref, zr_ref, b_ref, o_ref, acc_ref, *, apply_act):
    # acc(i) += adj(i,k) @ z_l(k); finalize with root branch + bias (+ act).
    k = pl.program_id(1)

    @pl.when(k == 0)
    def _init():
        acc_ref[...] = jnp.zeros_like(acc_ref)

    acc_ref[...] += jnp.dot(adj_ref[...], zl_ref[...],
                            preferred_element_type=jnp.float32)

    @pl.when(k == pl.num_programs(1) - 1)
    def _finalize():
        out = acc_ref[...] + zr_ref[...].astype(jnp.float32) + b_ref[...]
        if apply_act:
            out = jnp.where(out > 0, out, 0.1 * out)
        o_ref[...] = out.astype(o_ref.dtype)


def _sage_layer_tiled(h, adj_p, w_cat, b, *, ci_pad, co_pad, apply_act,
                      compute_dtype, out_dtype, tile_n, vmem_limit):
    n_pad = h.shape[0]
    rows = n_pad // tile_n

    # Step A: per-row-tile projection z = h @ [W_l | W_r]  (O(N*C^2), cheap).
    z = pl.pallas_call(
        _project_kernel,
        out_shape=jax.ShapeDtypeStruct((n_pad, 2 * co_pad), compute_dtype),
        grid=(rows,),
        in_specs=[pl.BlockSpec((tile_n, ci_pad), lambda i: (i, 0)),
                  pl.BlockSpec((ci_pad, 2 * co_pad), lambda i: (0, 0))],
        out_specs=pl.BlockSpec((tile_n, 2 * co_pad), lambda i: (i, 0)),
        compiler_params=pltpu.CompilerParams(
            dimension_semantics=("parallel",),
            vmem_limit_bytes=int(vmem_limit)),
        cost_estimate=pl.CostEstimate(
            flops=int(2 * n_pad * ci_pad * 2 * co_pad), transcendentals=0,
            bytes_accessed=int(h.size * h.dtype.itemsize
                               + w_cat.size * w_cat.dtype.itemsize
                               + n_pad * 2 * co_pad
                               * jnp.dtype(compute_dtype).itemsize)),
    )(h, w_cat)

    # Step B: row/k-tiled aggregation with f32 accumulator (P3 pattern).
    adj_bytes = adj_p.size * adj_p.dtype.itemsize
    out = pl.pallas_call(
        functools.partial(_aggregate_kernel, apply_act=apply_act),
        out_shape=jax.ShapeDtypeStruct((n_pad, co_pad), out_dtype),
        grid=(rows, rows),
        in_specs=[pl.BlockSpec((tile_n, tile_n), lambda i, k: (i, k)),
                  pl.BlockSpec((tile_n, co_pad), lambda i, k: (k, 0)),   # z_l
                  pl.BlockSpec((tile_n, co_pad), lambda i, k: (i, 1)),   # z_r
                  pl.BlockSpec((1, co_pad), lambda i, k: (0, 0))],       # bias
        out_specs=pl.BlockSpec((tile_n, co_pad), lambda i, k: (i, 0)),
        scratch_shapes=[pltpu.VMEM((tile_n, co_pad), jnp.float32)],
        compiler_params=pltpu.CompilerParams(
            dimension_semantics=("parallel", "arbitrary"),
            vmem_limit_bytes=int(vmem_limit)),
        cost_estimate=pl.CostEstimate(
            flops=int(2 * n_pad * n_pad * co_pad), transcendentals=0,
            bytes_accessed=int(adj_bytes
                               + 2 * n_pad * co_pad
                               * jnp.dtype(compute_dtype).itemsize
                               + n_pad * co_pad * jnp.dtype(out_dtype).itemsize)),
    )(adj_p, z, z, b)
    return out


def _tiled_call(adj_p, x_p, packed, layer_meta, n_pad, compute_dtype,
                vmem_limit, tile_n):
    h = x_p
    num_layers = len(layer_meta)
    for l, (ci_pad, co_pad, _proj_first, apply_act) in enumerate(layer_meta):
        out_dtype = jnp.float32 if l == num_layers - 1 else compute_dtype
        h = _sage_layer_tiled(h, adj_p, packed[2 * l], packed[2 * l + 1],
                              ci_pad=ci_pad, co_pad=co_pad, apply_act=apply_act,
                              compute_dtype=compute_dtype, out_dtype=out_dtype,
                              tile_n=tile_n, vmem_limit=vmem_limit)
    return h


# ----------------------------------------------------------------------------
# Host-side packing + dispatch wrapper.
# ----------------------------------------------------------------------------
def _pad_and_pack(x, adj, params, compute_dtype):
    n, c_in = x.shape
    n_pad = _round_up(n, _LANE)                       # lane-dense adjacency / MXU K
    c_dims = [c_in] + [w_l.shape[1] for (w_l, _, _) in params]
    c_pads = [_round_up(c, _LANE) for c in c_dims]    # per-layer channel padding

    # Zero-padded rows/cols/channels never contaminate real outputs.
    x_p = (jnp.zeros((n_pad, c_pads[0]), compute_dtype)
           .at[:n, :c_in].set(x.astype(compute_dtype)))
    adj_p = (jnp.zeros((n_pad, n_pad), compute_dtype)
             .at[:n, :n].set(adj.astype(compute_dtype)))

    packed, layer_meta = [], []
    num_layers = len(params)
    for l, (w_l, w_r, b) in enumerate(params):
        ci, co = w_l.shape
        ci_pad, co_pad = c_pads[l], c_pads[l + 1]
        w_cat = (jnp.zeros((ci_pad, 2 * co_pad), compute_dtype)
                 .at[:ci, :co].set(w_l.astype(compute_dtype))
                 .at[:ci, co_pad:co_pad + co].set(w_r.astype(compute_dtype)))
        b_p = jnp.zeros((1, co_pad), jnp.float32).at[:, :co].set(b.reshape(1, -1))
        packed += [w_cat, b_p]
        layer_meta.append((ci_pad, co_pad, co_pad <= ci_pad, l < num_layers - 1))
    return n_pad, c_pads, x_p, adj_p, packed, tuple(layer_meta)


def graphsage_forward(x, adj, params, *, compute_dtype=jnp.float32,
                      force_tiled=False, tile_n=128):
    """Full GraphSAGE stack (conv1 + convs + conv2) via Pallas.

    x      : (N, C_in) f32 node features
    adj    : (N, N) f32 row-normalized adjacency (mean aggregation)
    params : list of (W_l, W_r, b), W_* (C_in_l, C_out_l), b (1, C_out_l)
    """
    n = x.shape[0]
    c_out = params[-1][0].shape[1]
    n_pad, c_pads, x_p, adj_p, packed, layer_meta = _pad_and_pack(
        x, adj, params, compute_dtype)

    budget = _vmem_budget_bytes()
    item = jnp.dtype(compute_dtype).itemsize
    adj_bytes = n_pad * n_pad * item
    w_bytes = sum(ci * 2 * co * item for (ci, co, _, _) in layer_meta)
    est = (adj_bytes + n_pad * c_pads[0] * item + w_bytes
           + n_pad * c_pads[-1] * 4 + 4 * n_pad * max(c_pads) * 4)
    use_fused = (not force_tiled) and (2 * est <= budget)

    if use_fused:
        out_p = _fused_call(adj_p, x_p, packed, layer_meta, n_pad,
                            compute_dtype, budget)
    else:
        out_p = _tiled_call(adj_p, x_p, packed, layer_meta, n_pad,
                            compute_dtype, budget, tile_n)
    return out_p[:n, :c_out].astype(jnp.float32)


# ----------------------------------------------------------------------------
# Pure-JAX reference + param / graph builders (host side).
# ----------------------------------------------------------------------------
def graphsage_reference(x, adj, params):
    h = x
    n_layers = len(params)
    for idx, (w_l, w_r, b) in enumerate(params):
        out = adj @ (h @ w_l) + h @ w_r + b.reshape(1, -1)
        if idx < n_layers - 1:
            out = jnp.where(out > 0, out, 0.1 * out)
        h = out
    return h


def init_sage_params(key, c_in, c_out):
    k1, k2, k3 = jax.random.split(key, 3)
    scale = 1.0 / jnp.sqrt(jnp.float32(c_in))
    w_l = jax.random.uniform(k1, (c_in, c_out), jnp.float32, -scale, scale)
    w_r = jax.random.uniform(k2, (c_in, c_out), jnp.float32, -scale, scale)
    b = jax.random.uniform(k3, (1, c_out), jnp.float32, -scale, scale)
    return w_l, w_r, b


def build_graphsage_params(key, in_channels, out_channels, num_layers, num_filters):
    keys = jax.random.split(key, num_layers + 1)
    params = [init_sage_params(keys[0], in_channels, num_filters[0])]
    for i in range(num_layers - 1):
        params.append(init_sage_params(keys[i + 1], num_filters[i], num_filters[i + 1]))
    params.append(init_sage_params(keys[num_layers], num_filters[num_layers - 1], out_channels))
    return params


def edge_index_to_norm_adj(edge_index, num_nodes):
    """A[i, j] = 1 / deg_in(i) for edge j->i (PyG convention, mean aggregation)."""
    src, dst = edge_index[0], edge_index[1]
    a = jnp.zeros((num_nodes, num_nodes), jnp.float32).at[dst, src].add(1.0)
    deg = a.sum(axis=1, keepdims=True)
    return a / jnp.maximum(deg, 1.0)


if __name__ == "__main__":
    key = jax.random.PRNGKey(0)

    num_nodes = 16
    in_channels = 8
    out_channels = 6
    num_layers = 2
    num_filters = [32, 16]

    k_x, k_p, k_x2, k_a2 = jax.random.split(key, 4)
    x = jax.random.normal(k_x, (num_nodes, in_channels), jnp.float32)

    # Deterministic ring graph with both directions plus a few chords.
    src = jnp.concatenate([
        jnp.arange(num_nodes),
        (jnp.arange(num_nodes) + 1) % num_nodes,
        jnp.array([0, 3, 7, 11]),
    ]).astype(jnp.int32)
    dst = jnp.concatenate([
        (jnp.arange(num_nodes) + 1) % num_nodes,
        jnp.arange(num_nodes),
        jnp.array([8, 12, 2, 5]),
    ]).astype(jnp.int32)
    edge_index = jnp.stack([src, dst], axis=0)

    adj = edge_index_to_norm_adj(edge_index, num_nodes)
    params = build_graphsage_params(k_p, in_channels, out_channels,
                                    num_layers, num_filters)
    ref = graphsage_reference(x, adj, params)

    # Fused single-block path, f32 compute.
    out_f32 = jax.block_until_ready(
        graphsage_forward(x, adj, params, compute_dtype=jnp.float32))
    assert out_f32.shape == (num_nodes, out_channels)
    assert jnp.all(jnp.isfinite(out_f32))
    assert jnp.allclose(out_f32, ref, rtol=2e-3, atol=2e-3), "f32 fused mismatch"

    # Fused path, bf16 MXU operands (adj/x/weights stored bf16), f32 epilogue.
    out_bf16 = jax.block_until_ready(
        graphsage_forward(x, adj, params, compute_dtype=jnp.bfloat16))
    assert out_bf16.shape == (num_nodes, out_channels)
    assert jnp.all(jnp.isfinite(out_bf16))
    assert jnp.allclose(out_bf16, ref, rtol=5e-2, atol=5e-2), "bf16 fused mismatch"

    # Tiled per-layer path (forced) on a larger random graph: n_pad=384, grid 3x3.
    n2 = 300
    x2 = jax.random.normal(k_x2, (n2, in_channels), jnp.float32)
    a2 = (jax.random.uniform(k_a2, (n2, n2)) < 0.05).astype(jnp.float32)
    a2 = a2 * (1.0 - jnp.eye(n2, dtype=jnp.float32))
    adj2 = a2 / jnp.maximum(a2.sum(axis=1, keepdims=True), 1.0)
    ref2 = graphsage_reference(x2, adj2, params)

    out_tiled = jax.block_until_ready(
        graphsage_forward(x2, adj2, params, compute_dtype=jnp.float32,
                          force_tiled=True))
    assert out_tiled.shape == (n2, out_channels)
    assert jnp.all(jnp.isfinite(out_tiled))
    assert jnp.allclose(out_tiled, ref2, rtol=2e-3, atol=2e-3), "tiled mismatch"

    print("KERNEL_OK")
</pallas_src>

<mosaic_0001>
module attributes {stable_mosaic.version = 11 : i64} {
  func.func @_graphsage_fused_kernel(%arg0: memref<128x128xf32, #tpu.memory_space<vmem>>, %arg1: memref<128x128xf32, #tpu.memory_space<vmem>>, %arg2: memref<128x256xf32, #tpu.memory_space<vmem>>, %arg3: memref<1x128xf32, #tpu.memory_space<vmem>>, %arg4: memref<128x256xf32, #tpu.memory_space<vmem>>, %arg5: memref<1x128xf32, #tpu.memory_space<vmem>>, %arg6: memref<128x256xf32, #tpu.memory_space<vmem>>, %arg7: memref<1x128xf32, #tpu.memory_space<vmem>>, %arg8: memref<128x128xf32, #tpu.memory_space<vmem>>) attributes {dimension_semantics = [], scalar_prefetch = 0 : i64, scratch_operands = 0 : i64, tpu.core_type = #tpu.core_type<tc>} {
    %c0 = arith.constant 0 : index
    %c0_0 = arith.constant 0 : index
    %0 = vector.load %arg0[%c0, %c0_0] : memref<128x128xf32, #tpu.memory_space<vmem>>, vector<128x128xf32>
    %c0_1 = arith.constant 0 : index
    %c0_2 = arith.constant 0 : index
    %1 = vector.load %arg1[%c0_1, %c0_2] : memref<128x128xf32, #tpu.memory_space<vmem>>, vector<128x128xf32>
    %c0_3 = arith.constant 0 : index
    %c0_4 = arith.constant 0 : index
    %2 = vector.load %arg2[%c0_3, %c0_4] : memref<128x256xf32, #tpu.memory_space<vmem>>, vector<128x256xf32>
    %c0_5 = arith.constant 0 : index
    %c0_6 = arith.constant 0 : index
    %3 = vector.load %arg3[%c0_5, %c0_6] : memref<1x128xf32, #tpu.memory_space<vmem>>, vector<1x128xf32>
    %cst = arith.constant dense<0.000000e+00> : vector<128x256xf32>
    %4 = tpu.matmul %1, %2, %cst {dimension_numbers = #tpu.dot_dimension_numbers<[1], [0], [0], [1], [0, 0, 1, 1], [], []>} : vector<128x128xf32>, vector<128x256xf32>, vector<128x256xf32> -> vector<128x256xf32>
    %5 = vector.extract_strided_slice %4 {offsets = [0, 0], sizes = [128, 128], strides = [1, 1]} : vector<128x256xf32> to vector<128x128xf32>
    %6 = vector.extract_strided_slice %4 {offsets = [0, 128], sizes = [128, 128], strides = [1, 1]} : vector<128x256xf32> to vector<128x128xf32>
    %cst_7 = arith.constant dense<0.000000e+00> : vector<128x128xf32>
    %7 = tpu.matmul %0, %5, %cst_7 {dimension_numbers = #tpu.dot_dimension_numbers<[1], [0], [0], [1], [0, 0, 1, 1], [], []>} : vector<128x128xf32>, vector<128x128xf32>, vector<128x128xf32> -> vector<128x128xf32>
    %8 = arith.addf %7, %6 : vector<128x128xf32>
    %9 = vector.broadcast %3 : vector<1x128xf32> to vector<128x128xf32>
    %10 = arith.addf %8, %9 : vector<128x128xf32>
    %cst_8 = arith.constant 0.000000e+00 : f32
    %11 = vector.broadcast %cst_8 : f32 to vector<128x128xf32>
    %12 = arith.cmpf ogt, %10, %11 : vector<128x128xf32>
    %cst_9 = arith.constant 1.000000e-01 : f32
    %13 = vector.broadcast %cst_9 : f32 to vector<128x128xf32>
    %14 = arith.mulf %13, %10 : vector<128x128xf32>
    %15 = arith.select %12, %10, %14 : vector<128x128xi1>, vector<128x128xf32>
    %c0_10 = arith.constant 0 : index
    %c0_11 = arith.constant 0 : index
    %16 = vector.load %arg4[%c0_10, %c0_11] : memref<128x256xf32, #tpu.memory_space<vmem>>, vector<128x256xf32>
    %c0_12 = arith.constant 0 : index
    %c0_13 = arith.constant 0 : index
    %17 = vector.load %arg5[%c0_12, %c0_13] : memref<1x128xf32, #tpu.memory_space<vmem>>, vector<1x128xf32>
    %cst_14 = arith.constant dense<0.000000e+00> : vector<128x256xf32>
    %18 = tpu.matmul %15, %16, %cst_14 {dimension_numbers = #tpu.dot_dimension_numbers<[1], [0], [0], [1], [0, 0, 1, 1], [], []>} : vector<128x128xf32>, vector<128x256xf32>, vector<128x256xf32> -> vector<128x256xf32>
    %19 = vector.extract_strided_slice %18 {offsets = [0, 0], sizes = [128, 128], strides = [1, 1]} : vector<128x256xf32> to vector<128x128xf32>
    %20 = vector.extract_strided_slice %18 {offsets = [0, 128], sizes = [128, 128], strides = [1, 1]} : vector<128x256xf32> to vector<128x128xf32>
    %cst_15 = arith.constant dense<0.000000e+00> : vector<128x128xf32>
    %21 = tpu.matmul %0, %19, %cst_15 {dimension_numbers = #tpu.dot_dimension_numbers<[1], [0], [0], [1], [0, 0, 1, 1], [], []>} : vector<128x128xf32>, vector<128x128xf32>, vector<128x128xf32> -> vector<128x128xf32>
    %22 = arith.addf %21, %20 : vector<128x128xf32>
    %23 = vector.broadcast %17 : vector<1x128xf32> to vector<128x128xf32>
    %24 = arith.addf %22, %23 : vector<128x128xf32>
    %cst_16 = arith.constant 0.000000e+00 : f32
    %25 = vector.broadcast %cst_16 : f32 to vector<128x128xf32>
    %26 = arith.cmpf ogt, %24, %25 : vector<128x128xf32>
    %cst_17 = arith.constant 1.000000e-01 : f32
    %27 = vector.broadcast %cst_17 : f32 to vector<128x128xf32>
    %28 = arith.mulf %27, %24 : vector<128x128xf32>
    %29 = arith.select %26, %24, %28 : vector<128x128xi1>, vector<128x128xf32>
    %c0_18 = arith.constant 0 : index
    %c0_19 = arith.constant 0 : index
    %30 = vector.load %arg6[%c0_18, %c0_19] : memref<128x256xf32, #tpu.memory_space<vmem>>, vector<128x256xf32>
    %c0_20 = arith.constant 0 : index
    %c0_21 = arith.constant 0 : index
    %31 = vector.load %arg7[%c0_20, %c0_21] : memref<1x128xf32, #tpu.memory_space<vmem>>, vector<1x128xf32>
    %cst_22 = arith.constant dense<0.000000e+00> : vector<128x256xf32>
    %32 = tpu.matmul %29, %30, %cst_22 {dimension_numbers = #tpu.dot_dimension_numbers<[1], [0], [0], [1], [0, 0, 1, 1], [], []>} : vector<128x128xf32>, vector<128x256xf32>, vector<128x256xf32> -> vector<128x256xf32>
    %33 = vector.extract_strided_slice %32 {offsets = [0, 0], sizes = [128, 128], strides = [1, 1]} : vector<128x256xf32> to vector<128x128xf32>
    %34 = vector.extract_strided_slice %32 {offsets = [0, 128], sizes = [128, 128], strides = [1, 1]} : vector<128x256xf32> to vector<128x128xf32>
    %cst_23 = arith.constant dense<0.000000e+00> : vector<128x128xf32>
    %35 = tpu.matmul %0, %33, %cst_23 {dimension_numbers = #tpu.dot_dimension_numbers<[1], [0], [0], [1], [0, 0, 1, 1], [], []>} : vector<128x128xf32>, vector<128x128xf32>, vector<128x128xf32> -> vector<128x128xf32>
    %36 = arith.addf %35, %34 : vector<128x128xf32>
    %37 = vector.broadcast %31 : vector<1x128xf32> to vector<128x128xf32>
    %38 = arith.addf %36, %37 : vector<128x128xf32>
    %c0_24 = arith.constant 0 : index
    %c0_25 = arith.constant 0 : index
    %39 = vector.load %arg8[%c0_24, %c0_25] : memref<128x128xf32, #tpu.memory_space<vmem>>, vector<128x128xf32>
    tpu.vector_store %arg8[%c0_24, %c0_25], %38 {strides = array<i32>} : memref<128x128xf32, #tpu.memory_space<vmem>>, vector<128x128xf32>,
    return
  }
}

</mosaic_0001>

<bundles_post_ra>
// kernel: tpu_custom_call.1
= control target key start
LH: loop header
LB: loop body
LE: loop exit
PB: predicated region body
PF: predicated region fallthrough
CT: control target
= control target key end

     0   :  { %13 = vsyncpa [#allocation3], 0  ;;  %s1516_s0 = inlined_call_operand.hbm [shape: f32[128,128], index: 0, kind: input, shape index: {}]   ;;  %s1517_s1 = inlined_call_operand.hbm [shape: f32[128,128], index: 1, kind: input, shape index: {}]   ;;  %s1518_s2 = inlined_call_operand.hbm [shape: f32[128,256], index: 2, kind: input, shape index: {}]   ;;  %s1519_s3 = inlined_call_operand.vmem [shape: f32[1,128], index: 3, kind: input, shape index: {}]   ;;  %s1520_s4 = inlined_call_operand.hbm [shape: f32[128,256], index: 4, kind: input, shape index: {}]   ;;  %s1521_s5 = inlined_call_operand.vmem [shape: f32[1,128], index: 5, kind: input, shape index: {}]   ;;  %s1522_s6 = inlined_call_operand.hbm [shape: f32[128,256], index: 6, kind: input, shape index: {}]   ;;  %s1523_s7 = inlined_call_operand.vmem [shape: f32[1,128], index: 7, kind: input, shape index: {}]   ;;  %s1524_s8 = inlined_call_operand.hbm [shape: f32[128,128], index: 8, kind: output, shape index: {}]  }
   0x1   :  { %14 = vsyncpa [#allocation6], 0 }
   0x2   :  { %15 = vsyncpa [#allocation9], 0 }
   0x3   :  { %16 = vsyncpa [#allocation4], 0  ;;  %s34_s29 = sshll.u32 %s1517_s1, 4  ;;  %s1238_s30 = smov [#allocation5]   ;;  %s35_s29 = int_to_ptr.hbm [resolvable:$true] %s34_s29 }
   0x4   :  { %s36_s9 = sshll.u32 %s1238_s30, 4  ;;  %s1239_s10 = smov 128   ;;  %s37_s9 = int_to_ptr.vmem [resolvable:$true] %s36_s9 }
   0x5   :  { %s1240_s11 = smov 8   ;;  %s62_s14 = sshll.u32 %s1520_s4, 4  ;;  %s63_s14 = int_to_ptr.hbm [resolvable:$true] %s62_s14 }
   0x6   :  { %42 = dma.hbm_to_vmem [thread:$0]  %s35_s29, 2048, %s37_s9, [#allocation6], %s1239_s10, %s1239_s10, %s1240_s11  }
   0x7   :  { %s1241_s15 = smov [#allocation8]   ;;  %s21_s1 = sshll.u32 %s1516_s0, 4  ;;  %s22_s1 = int_to_ptr.hbm [resolvable:$true] %s21_s1 }
   0x8   :  { %s64_s16 = sshll.u32 %s1241_s15, 4  ;;  %s1242_s19 = smov 256   ;;  %s65_s16 = int_to_ptr.vmem [resolvable:$true] %s64_s16 }
   0x9   :  { %s1243_s20 = smov 16   ;;  %s47_s23 = sshll.u32 %s1518_s2, 4  ;;  %s48_s23 = int_to_ptr.hbm [resolvable:$true] %s47_s23 }
   0xa   :  { %70 = dma.hbm_to_vmem [thread:$0]  %s63_s14, 4096, %s65_s16, [#allocation9], %s1242_s19, %s1242_s19, %s1243_s20  }
   0xb   :  { %s1244_s24 = smov [#allocation2]   ;;  %s1245_s4 = smov [#allocation7]  }
   0xc   :  { %s23_s25 = sshll.u32 %s1244_s24, 4  ;;  %s49_s26 = sshll.u32 %s1245_s4, 4  ;;  %s24_s25 = int_to_ptr.vmem [resolvable:$true] %s23_s25  ;;  %s50_s26 = int_to_ptr.vmem [resolvable:$true] %s49_s26 }
   0xd   :  { %29 = dma.hbm_to_vmem [thread:$0]  %s22_s1, 2048, %s24_s25, [#allocation3], %s1239_s10, %s1239_s10, %s1240_s11  }
   0xe   :  { %s77_s28 = sshll.u32 %s1522_s6, 4  ;;  %s1246_s29 = smov [#allocation10]   ;;  %s78_s28 = int_to_ptr.hbm [resolvable:$true] %s77_s28 }
   0xf   :  { %55 = dma.hbm_to_vmem [thread:$0]  %s48_s23, 4096, %s50_s26, [#allocation6], %s1242_s19, %s1242_s19, %s1243_s20  }
  0x10   :  { %s79_s30 = sshll.u32 %s1246_s29, 4  ;;  %s80_s30 = int_to_ptr.vmem [resolvable:$true] %s79_s30 }
  0x11   :  { %85 = dma.hbm_to_vmem [thread:$0]  %s78_s28, 4096, %s80_s30, [#allocation9], %s1242_s19, %s1242_s19, %s1243_s20  }
  0x12   :  { %1230 = dma.done.wait [#allocation3], 2048  }
  0x13   :  { %1231 = vsyncadd [#allocation3], 4294965248 }
  0x14   :  { %1232 = dma.done.wait [#allocation6], 6144  }
  0x15   :  { %1233 = vsyncadd [#allocation6], 4294961152 }
  0x16   :  { %1234 = dma.done.wait [#allocation9], 8192  }
  0x17   :  { %1235 = vsyncadd [#allocation9], 4294959104  ;;  %v170_v0 = vld [vmem:[#allocation7 + $0xf0] sm:$0xff]  ;;  %v168_v1 = vld [vmem:[#allocation7 + $0xe0] sm:$0xff]  ;;  %s999_s16 = sshll.u32 %s1524_s8, 4  ;;  %s1000_s16 = int_to_ptr.hbm [resolvable:$true] %s999_s16 }
  0x18   :  { %1016 = vmatpush.msra.mxu3 %v170_v0  ;;  %1015 = vmatpush.msra.mxu2 %v170_v0  ;;  %v166_v2 = vld [vmem:[#allocation7 + $0xd0] sm:$0xff]  ;;  %v164_v3 = vld [vmem:[#allocation7 + $0xc0] sm:$0xff]  ;;  %v1326_v20 = vld [vmem:[#allocation5 + $0x68] sm:$0xff] }
  0x19   :  { %1014 = vmatpush.msra.mxu1 %v170_v0  ;;  %173 = vmatpush.msra.mxu0 %v170_v0  ;;  %v162_v4 = vld [vmem:[#allocation7 + $0xb0] sm:$0xff]  ;;  %v160_v5 = vld [vmem:[#allocation7 + $0xa0] sm:$0xff]  ;;  %v1328_v21 = vld [vmem:[#allocation5 + $0x48] sm:$0xff] }
  0x1a   :  { %1019 = vmatpush.msra.mxu3 %v168_v1  ;;  %1018 = vmatpush.msra.mxu2 %v168_v1  ;;  %v158_v6 = vld [vmem:[#allocation7 + $0x90] sm:$0xff]  ;;  %v156_v7 = vld [vmem:[#allocation7 + $0x80] sm:$0xff]  ;;  %v1330_v22 = vld [vmem:[#allocation5 + $0x28] sm:$0xff] }
  0x1b   :  { %1017 = vmatpush.msra.mxu1 %v168_v1  ;;  %174 = vmatpush.msra.mxu0 %v168_v1  ;;  %v154_v8 = vld [vmem:[#allocation7 + $0x70] sm:$0xff]  ;;  %v152_v9 = vld [vmem:[#allocation7 + $0x60] sm:$0xff]  ;;  %v1332_v23 = vld [vmem:[#allocation5 + $0x8] sm:$0xff] }
  0x1c   :  { %1022 = vmatpush.msra.mxu3 %v166_v2  ;;  %1021 = vmatpush.msra.mxu2 %v166_v2  ;;  %v150_v10 = vld [vmem:[#allocation7 + $0x50] sm:$0xff]  ;;  %v148_v11 = vld [vmem:[#allocation7 + $0x40] sm:$0xff]  ;;  %v1350_v28 = vld [vmem:[#allocation5 + $0x78] sm:$0xff] }
  0x1d   :  { %1020 = vmatpush.msra.mxu1 %v166_v2  ;;  %175 = vmatpush.msra.mxu0 %v166_v2  ;;  %v146_v12 = vld [vmem:[#allocation7 + $0x30] sm:$0xff]  ;;  %v144_v13 = vld [vmem:[#allocation7 + $0x20] sm:$0xff]  ;;  %v1352_v29 = vld [vmem:[#allocation5 + $0x58] sm:$0xff] }
  0x1e   :  { %1025 = vmatpush.msra.mxu3 %v164_v3  ;;  %1024 = vmatpush.msra.mxu2 %v164_v3  ;;  %v142_v14 = vld [vmem:[#allocation7 + $0x10] sm:$0xff]  ;;  %v140_v15 = vld [vmem:[#allocation7] sm:$0xff]  ;;  %v1354_v30 = vld [vmem:[#allocation5 + $0x38] sm:$0xff] }
  0x1f   :  { %1023 = vmatpush.msra.mxu1 %v164_v3  ;;  %176 = vmatpush.msra.mxu0 %v164_v3  ;;  %v1314_v16 = vld [vmem:[#allocation5 + $0x60] sm:$0xff]  ;;  %v1338_v24 = vld [vmem:[#allocation5 + $0x70] sm:$0xff]  ;;  %v1356_v31 = vld [vmem:[#allocation5 + $0x18] sm:$0xff] }
  0x20   :  { %1028 = vmatpush.msra.mxu3 %v162_v4  ;;  %1027 = vmatpush.msra.mxu2 %v162_v4  ;;  %v1316_v17 = vld [vmem:[#allocation5 + $0x40] sm:$0xff]  ;;  %v1340_v25 = vld [vmem:[#allocation5 + $0x50] sm:$0xff]  ;;  %v171_v32 = vld [vmem:[#allocation7 + $0xf8] sm:$0xff] }
  0x21   :  { %1026 = vmatpush.msra.mxu1 %v162_v4  ;;  %177 = vmatpush.msra.mxu0 %v162_v4  ;;  %v1318_v18 = vld [vmem:[#allocation5 + $0x20] sm:$0xff]  ;;  %v1342_v26 = vld [vmem:[#allocation5 + $0x30] sm:$0xff]  ;;  %v169_v33 = vld [vmem:[#allocation7 + $0xe8] sm:$0xff] }
  0x22   :  { %1031 = vmatpush.msra.mxu3 %v160_v5  ;;  %1030 = vmatpush.msra.mxu2 %v160_v5  ;;  %v1320_v19 = vld [vmem:[#allocation5] sm:$0xff]  ;;  %v1344_v27 = vld [vmem:[#allocation5 + $0x10] sm:$0xff]  ;;  %v167_v36 = vld [vmem:[#allocation7 + $0xd8] sm:$0xff] }
  0x23   :  { %1029 = vmatpush.msra.mxu1 %v160_v5  ;;  %178 = vmatpush.msra.mxu0 %v160_v5  ;;  %v165_v37 = vld [vmem:[#allocation7 + $0xc8] sm:$0xff]  ;;  %v163_v38 = vld [vmem:[#allocation7 + $0xb8] sm:$0xff]  ;;  %v1365_v0 = vld [vmem:[#allocation2] sm:$0xff] }
  0x24   :  { %1034 = vmatpush.msra.mxu3 %v158_v6  ;;  %1033 = vmatpush.msra.mxu2 %v158_v6  ;;  %v161_v39 = vld [vmem:[#allocation7 + $0xa8] sm:$0xff]  ;;  %v159_v42 = vld [vmem:[#allocation7 + $0x98] sm:$0xff]  ;;  %v1373_v2 = vld [vmem:[#allocation2 + $0x10] sm:$0xff] }
  0x25   :  { %1032 = vmatpush.msra.mxu1 %v158_v6  ;;  %179 = vmatpush.msra.mxu0 %v158_v6  ;;  %v157_v44 = vld [vmem:[#allocation7 + $0x88] sm:$0xff]  ;;  %v155_v45 = vld [vmem:[#allocation7 + $0x78] sm:$0xff]  ;;  %v1381_v4 = vld [vmem:[#allocation2 + $0x20] sm:$0xff] }
  0x26   :  { %1037 = vmatpush.msra.mxu3 %v156_v7  ;;  %1036 = vmatpush.msra.mxu2 %v156_v7  ;;  %v153_v46 = vld [vmem:[#allocation7 + $0x68] sm:$0xff]  ;;  %v151_v49 = vld [vmem:[#allocation7 + $0x58] sm:$0xff]  ;;  %v1389_v6 = vld [vmem:[#allocation2 + $0x30] sm:$0xff] }
  0x27   :  { %1035 = vmatpush.msra.mxu1 %v156_v7  ;;  %180 = vmatpush.msra.mxu0 %v156_v7  ;;  %v149_v51 = vld [vmem:[#allocation7 + $0x48] sm:$0xff]  ;;  %v147_v53 = vld [vmem:[#allocation7 + $0x38] sm:$0xff] }
  0x28   :  { %1040 = vmatpush.msra.mxu3 %v154_v8  ;;  %1039 = vmatpush.msra.mxu2 %v154_v8  ;;  %v145_v55 = vld [vmem:[#allocation7 + $0x28] sm:$0xff]  ;;  %v143_v56 = vld [vmem:[#allocation7 + $0x18] sm:$0xff] }
  0x29   :  { %1038 = vmatpush.msra.mxu1 %v154_v8  ;;  %181 = vmatpush.msra.mxu0 %v154_v8  ;;  %v141_v58 = vld [vmem:[#allocation7 + $0x8] sm:$0xff]  ;;  %v1377_v3 = vld [vmem:[#allocation2 + $0x18] sm:$0xff]  ;;  %v1397_v8 = vld [vmem:[#allocation2 + $0x40] sm:$0xff] }
  0x2a   :  { %1043 = vmatpush.msra.mxu3 %v152_v9  ;;  %1042 = vmatpush.msra.mxu2 %v152_v9  ;;  %v1369_v1 = vld [vmem:[#allocation2 + $0x8] sm:$0xff]  ;;  %v1393_v7 = vld [vmem:[#allocation2 + $0x38] sm:$0xff] }
  0x2b   :  { %1041 = vmatpush.msra.mxu1 %v152_v9  ;;  %182 = vmatpush.msra.mxu0 %v152_v9  ;;  %v1385_v5 = vld [vmem:[#allocation2 + $0x28] sm:$0xff] }
  0x2c   :  { %1046 = vmatpush.msra.mxu3 %v150_v10  ;;  %1045 = vmatpush.msra.mxu2 %v150_v10  ;;  %v1401_v9 = vld [vmem:[#allocation2 + $0x48] sm:$0xff] }
  0x2d   :  { %1044 = vmatpush.msra.mxu1 %v150_v10  ;;  %183 = vmatpush.msra.mxu0 %v150_v10  ;;  %v465_v10 = vld [vmem:[#allocation8 + $0xf0] sm:$0xff] }
  0x2e   :  { %1049 = vmatpush.msra.mxu3 %v148_v11  ;;  %1048 = vmatpush.msra.mxu2 %v148_v11 }
  0x2f   :  { %1047 = vmatpush.msra.mxu1 %v148_v11  ;;  %184 = vmatpush.msra.mxu0 %v148_v11  ;;  %v466_v11 = vld [vmem:[#allocation8 + $0xf8] sm:$0xff] }
  0x30   :  { %1052 = vmatpush.msra.mxu3 %v146_v12  ;;  %1051 = vmatpush.msra.mxu2 %v146_v12 }
  0x31   :  { %1050 = vmatpush.msra.mxu1 %v146_v12  ;;  %185 = vmatpush.msra.mxu0 %v146_v12  ;;  %v463_v12 = vld [vmem:[#allocation8 + $0xe0] sm:$0xff] }
  0x32   :  { %1055 = vmatpush.msra.mxu3 %v144_v13  ;;  %1054 = vmatpush.msra.mxu2 %v144_v13 }
  0x33   :  { %1053 = vmatpush.msra.mxu1 %v144_v13  ;;  %186 = vmatpush.msra.mxu0 %v144_v13  ;;  %v464_v13 = vld [vmem:[#allocation8 + $0xe8] sm:$0xff] }
  0x34   :  { %1058 = vmatpush.msra.mxu3 %v142_v14  ;;  %1057 = vmatpush.msra.mxu2 %v142_v14 }
  0x35   :  { %1056 = vmatpush.msra.mxu1 %v142_v14  ;;  %187 = vmatpush.msra.mxu0 %v142_v14  ;;  %v1405_v14 = vld [vmem:[#allocation2 + $0x50] sm:$0xff] }
  0x36   :  { %1061 = vmatpush.msra.mxu3 %v140_v15  ;;  %1060 = vmatpush.msra.mxu2 %v140_v15 }
  0x37   :  { %225 = vmatmul.f32.vlgmr.msra.gmra.mxu3 %v1314_v16  ;;  %213 = vmatmul.f32.vlgmr.msra.gmra.mxu2 %v1316_v17 }
  0x38   :  { %1059 = vmatpush.msra.mxu1 %v140_v15  ;;  %188 = vmatpush.msra.mxu0 %v140_v15  ;;  %v461_v15 = vld [vmem:[#allocation8 + $0xd0] sm:$0xff] }
  0x39   :  { %201 = vmatmul.f32.vlgmr.msra.gmra.mxu1 %v1318_v18  ;;  %189 = vmatmul.f32.vlgmr.msra.gmra.mxu0 %v1320_v19 }
  0x3a   :  { %238 = vmatpush.msrb.mxu1 %v171_v32  ;;  %468 = vmatpush.msrb.mxu3 %v465_v10  ;;  %v447_v32 = vld [vmem:[#allocation8 + $0x60] sm:$0xff] }
  0x3b   :  { %533 = vmatpush.msrb.mxu0 %v466_v11 }
  0x3c   :  { %239 = vmatpush.msrb.mxu1 %v169_v33  ;;  %469 = vmatpush.msrb.mxu3 %v463_v12  ;;  %v448_v33 = vld [vmem:[#allocation8 + $0x68] sm:$0xff] }
  0x3d   :  { %534 = vmatpush.msrb.mxu0 %v464_v13 }
  0x3e   :  { %240 = vmatpush.msrb.mxu1 %v167_v36  ;;  %470 = vmatpush.msrb.mxu3 %v461_v15  ;;  %v443_v36 = vld [vmem:[#allocation8 + $0x40] sm:$0xff] }
  0x3f   :  { %228 = vmatmul.f32.gmra.mxu3 %v1326_v20  ;;  %216 = vmatmul.f32.gmra.mxu2 %v1328_v21 }
  0x40   :  { %241 = vmatpush.msrb.mxu1 %v165_v37  ;;  %v444_v37 = vld [vmem:[#allocation8 + $0x48] sm:$0xff] }
  0x41   :  { %204 = vmatmul.f32.gmra.mxu1 %v1330_v22  ;;  %192 = vmatmul.f32.gmra.mxu0 %v1332_v23 }
  0x42   :  { %242 = vmatpush.msrb.mxu1 %v163_v38 }
  0x44   :  { %243 = vmatpush.msrb.mxu1 %v161_v39  ;;  %v441_v39 = vld [vmem:[#allocation8 + $0x30] sm:$0xff] }
  0x46   :  { %244 = vmatpush.msrb.mxu1 %v159_v42  ;;  %v439_v42 = vld [vmem:[#allocation8 + $0x20] sm:$0xff] }
  0x47   :  { %231 = vmatmul.f32.gmra.mxu3 %v1338_v24  ;;  %219 = vmatmul.f32.gmra.mxu2 %v1340_v25 }
  0x48   :  { %245 = vmatpush.msrb.mxu1 %v157_v44  ;;  %v438_v44 = vld [vmem:[#allocation8 + $0x18] sm:$0xff] }
  0x49   :  { %207 = vmatmul.f32.gmra.mxu1 %v1342_v26  ;;  %195 = vmatmul.f32.gmra.mxu0 %v1344_v27 }
  0x4a   :  { %246 = vmatpush.msrb.mxu1 %v155_v45  ;;  %v435_v45 = vld [vmem:[#allocation8] sm:$0xff] }
  0x4c   :  { %247 = vmatpush.msrb.mxu1 %v153_v46  ;;  %v436_v46 = vld [vmem:[#allocation8 + $0x8] sm:$0xff] }
  0x4e   :  { %248 = vmatpush.msrb.mxu1 %v151_v49  ;;  %v1423_v49 = vld [vmem:[#allocation2 + $0x78] sm:$0xff] }
  0x4f   :  { %234 = vmatmul.f32.gmra.mxu3 %v1350_v28  ;;  %222 = vmatmul.f32.gmra.mxu2 %v1352_v29 }
  0x50   :  { %249 = vmatpush.msrb.mxu1 %v149_v51 }
  0x51   :  { %210 = vmatmul.f32.gmra.mxu1 %v1354_v30  ;;  %198 = vmatmul.f32.gmra.mxu0 %v1356_v31 }
  0x52   :  { %250 = vmatpush.msrb.mxu1 %v147_v53 }
  0x54   :  { %251 = vmatpush.msrb.mxu1 %v145_v55 }
  0x56   :  { %252 = vmatpush.msrb.mxu1 %v143_v56 }
  0x58   :  { %253 = vmatpush.msrb.mxu1 %v141_v58 }
  0x59   :  { %254 = vmatmul.f32.vlgmr.msrb.gmra.mxu1 %v1320_v19  ;;  %v457_v19 = vld [vmem:[#allocation8 + $0xb0] sm:$0xff] }
  0x61   :  { %257 = vmatmul.f32.gmra.mxu1 %v1332_v23  ;;  %v456_v23 = vld [vmem:[#allocation8 + $0xa8] sm:$0xff] }
  0x69   :  { %260 = vmatmul.f32.gmra.mxu1 %v1344_v27  ;;  %v451_v27 = vld [vmem:[#allocation8 + $0x80] sm:$0xff] }
  0x71   :  { %263 = vmatmul.f32.gmra.mxu1 %v1356_v31  ;;  %v450_v31 = vld [vmem:[#allocation8 + $0x78] sm:$0xff] }
  0x79   :  { %266 = vmatmul.f32.gmra.mxu1 %v1318_v18  ;;  %v460_v18 = vld [vmem:[#allocation8 + $0xc8] sm:$0xff] }
  0x81   :  { %269 = vmatmul.f32.gmra.mxu1 %v1330_v22  ;;  %v455_v22 = vld [vmem:[#allocation8 + $0xa0] sm:$0xff] }
  0x89   :  { %272 = vmatmul.f32.gmra.mxu1 %v1342_v26  ;;  %v454_v26 = vld [vmem:[#allocation8 + $0x98] sm:$0xff] }
  0x91   :  { %275 = vmatmul.f32.gmra.mxu1 %v1354_v30  ;;  %v449_v30 = vld [vmem:[#allocation8 + $0x70] sm:$0xff] }
  0x99   :  { %278 = vmatmul.f32.gmra.mxu1 %v1316_v17  ;;  %v462_v17 = vld [vmem:[#allocation8 + $0xd8] sm:$0xff] }
  0x9a   :  { %535 = vmatpush.msrb.mxu0 %v462_v17 }
  0x9c   :  { %536 = vmatpush.msrb.mxu0 %v460_v18 }
  0xa1   :  { %281 = vmatmul.f32.gmra.mxu1 %v1328_v21  ;;  %v458_v21 = vld [vmem:[#allocation8 + $0xb8] sm:$0xff] }
  0xa2   :  { %537 = vmatpush.msrb.mxu0 %v458_v21 }
  0xa4   :  { %538 = vmatpush.msrb.mxu0 %v456_v23 }
  0xa6   :  { %539 = vmatpush.msrb.mxu0 %v454_v26 }
  0xa9   :  { %284 = vmatmul.f32.gmra.mxu1 %v1340_v25  ;;  %v1409_v25 = vld [vmem:[#allocation2 + $0x58] sm:$0xff] }
  0xb1   :  { %287 = vmatmul.f32.gmra.mxu1 %v1352_v29  ;;  %v452_v29 = vld [vmem:[#allocation8 + $0x88] sm:$0xff] }
  0xb2   :  { %540 = vmatpush.msrb.mxu0 %v452_v29 }
  0xb4   :  { %541 = vmatpush.msrb.mxu0 %v450_v31 }
  0xb6   :  { %v202_v41 = vpop.f32.mrf.mxu1  ;;  %v190_v48 = vpop.f32.mrf.mxu0  ;;  %542 = vmatpush.msrb.mxu0 %v448_v33 }
  0xb9   :  { %290 = vmatmul.f32.gmra.mxu1 %v1314_v16  ;;  %v459_v16 = vld [vmem:[#allocation8 + $0xc0] sm:$0xff] }
  0xba   :  { %v226_v34 = vpop.f32.mrf.mxu3  ;;  %v214_v35 = vpop.f32.mrf.mxu2  ;;  %471 = vmatpush.msrb.mxu3 %v459_v16 }
  0xbc   :  { %472 = vmatpush.msrb.mxu3 %v457_v19 }
  0xbe   :  { %v205_v50 = vpop.f32.mrf.mxu1  ;;  %v193_v57 = vpop.f32.mrf.mxu0  ;;  %473 = vmatpush.msrb.mxu3 %v455_v22 }
  0xc1   :  { %293 = vmatmul.f32.gmra.mxu1 %v1326_v20  ;;  %v453_v20 = vld [vmem:[#allocation8 + $0x90] sm:$0xff] }
  0xc2   :  { %v229_v40 = vpop.f32.mrf.mxu3  ;;  %v217_v43 = vpop.f32.mrf.mxu2  ;;  %474 = vmatpush.msrb.mxu3 %v453_v20 }
  0xc4   :  { %475 = vmatpush.msrb.mxu3 %v451_v27 }
  0xc6   :  { %v208_v59 = vpop.f32.mrf.mxu1  ;;  %v196_v61 = vpop.f32.mrf.mxu0  ;;  %476 = vmatpush.msrb.mxu3 %v449_v30 }
  0xc8   :  { %477 = vmatpush.msrb.mxu3 %v447_v32 }
  0xc9   :  { %296 = vmatmul.f32.gmra.mxu1 %v1338_v24  ;;  %v445_v24 = vld [vmem:[#allocation8 + $0x50] sm:$0xff] }
  0xca   :  { %v232_v47 = vpop.f32.mrf.mxu3  ;;  %v220_v52 = vpop.f32.mrf.mxu2  ;;  %478 = vmatpush.msrb.mxu3 %v445_v24 }
  0xcc   :  { %479 = vmatpush.msrb.mxu3 %v443_v36 }
  0xce   :  { %v211_v62 = vpop.f32.mrf.mxu1  ;;  %v199_v63 = vpop.f32.mrf.mxu0  ;;  %480 = vmatpush.msrb.mxu3 %v441_v39 }
  0xd0   :  { %481 = vmatpush.msrb.mxu3 %v439_v42 }
  0xd1   :  { %299 = vmatmul.f32.gmra.mxu1 %v1350_v28  ;;  %v440_v28 = vld [vmem:[#allocation8 + $0x28] sm:$0xff] }
  0xd2   :  { %v235_v54 = vpop.f32.mrf.mxu3  ;;  %v223_v60 = vpop.f32.mrf.mxu2 }
  0xd3   :  { %303 = vmatpush.msrb.mxu2 %v235_v54 }
  0xd5   :  { %304 = vmatpush.msrb.mxu2 %v232_v47  ;;  %v1420_v47 = vld [vmem:[#allocation2 + $0x70] sm:$0xff] }
  0xd6   :  { %v255_v38 = vpop.f32.mrf.mxu1 }
  0xd7   :  { %305 = vmatpush.msrb.mxu2 %v229_v40  ;;  %v442_v40 = vld [vmem:[#allocation8 + $0x38] sm:$0xff] }
  0xd9   :  { %306 = vmatpush.msrb.mxu2 %v226_v34  ;;  %v1413_v34 = vld [vmem:[#allocation2 + $0x60] sm:$0xff] }
  0xdb   :  { %307 = vmatpush.msrb.mxu2 %v223_v60 }
  0xdd   :  { %308 = vmatpush.msrb.mxu2 %v220_v52  ;;  %v1429_v52 = vld [vmem:[%s1519_s3] ss:$0 sm:$0xff] }
  0xdf   :  { %309 = vmatpush.msrb.mxu2 %v217_v43  ;;  %v437_v43 = vld [vmem:[#allocation8 + $0x10] sm:$0xff] }
  0xe0   :  { %482 = vmatpush.msrb.mxu3 %v437_v43 }
  0xe1   :  { %310 = vmatpush.msrb.mxu2 %v214_v35  ;;  %v446_v35 = vld [vmem:[#allocation8 + $0x58] sm:$0xff] }
  0xe2   :  { %543 = vmatpush.msrb.mxu0 %v446_v35  ;;  %483 = vmatpush.msrb.mxu3 %v435_v45 }
  0xe3   :  { %311 = vmatpush.msrb.mxu2 %v211_v62 }
  0xe4   :  { %544 = vmatpush.msrb.mxu0 %v444_v37 }
  0xe5   :  { %312 = vmatpush.msrb.mxu2 %v208_v59 }
  0xe6   :  { %545 = vmatpush.msrb.mxu0 %v442_v40 }
  0xe7   :  { %313 = vmatpush.msrb.mxu2 %v205_v50 }
  0xe8   :  { %546 = vmatpush.msrb.mxu0 %v440_v28 }
  0xe9   :  { %314 = vmatpush.msrb.mxu2 %v202_v41  ;;  %v1417_v41 = vld [vmem:[#allocation2 + $0x68] sm:$0xff] }
  0xea   :  { %547 = vmatpush.msrb.mxu0 %v438_v44 }
  0xeb   :  { %315 = vmatpush.msrb.mxu2 %v199_v63 }
  0xec   :  { %548 = vmatpush.msrb.mxu0 %v436_v46 }
  0xed   :  { %316 = vmatpush.msrb.mxu2 %v196_v61 }
  0xef   :  { %317 = vmatpush.msrb.mxu2 %v193_v57 }
  0xf1   :  { %318 = vmatpush.msrb.mxu2 %v190_v48  ;;  %v258_v48 = vpop.f32.mrf.mxu1 }
  0xf2   :  { %319 = vmatmul.f32.vlgmr.msrb.gmra.mxu2 %v1365_v0 }
  0xf9   :  { %v261_v50 = vpop.f32.mrf.mxu1 }
  0xfa   :  { %322 = vmatmul.f32.gmra.mxu2 %v1369_v1 }
 0x101   :  { %v264_v51 = vpop.f32.mrf.mxu1 }
 0x102   :  { %325 = vmatmul.f32.gmra.mxu2 %v1373_v2 }
 0x109   :  { %v267_v59 = vpop.f32.mrf.mxu1 }
 0x10a   :  { %328 = vmatmul.f32.gmra.mxu2 %v1377_v3 }
 0x111   :  { %v270_v12 = vpop.f32.mrf.mxu1 }
 0x112   :  { %331 = vmatmul.f32.gmra.mxu2 %v1381_v4 }
 0x119   :  { %v273_v21 = vpop.f32.mrf.mxu1 }
 0x11a   :  { %334 = vmatmul.f32.gmra.mxu2 %v1385_v5 }
 0x121   :  { %v276_v30 = vpop.f32.mrf.mxu1 }
 0x122   :  { %337 = vmatmul.f32.gmra.mxu2 %v1389_v6 }
 0x12a   :  { %340 = vmatmul.f32.gmra.mxu2 %v1393_v7 }
 0x132   :  { %343 = vmatmul.f32.gmra.mxu2 %v1397_v8 }
 0x13a   :  { %346 = vmatmul.f32.gmra.mxu2 %v1401_v9 }
 0x142   :  { %349 = vmatmul.f32.gmra.mxu2 %v1405_v14 }
 0x14a   :  { %352 = vmatmul.f32.gmra.mxu2 %v1409_v25 }
 0x152   :  { %355 = vmatmul.f32.gmra.mxu2 %v1413_v34 }
 0x15a   :  { %358 = vmatmul.f32.gmra.mxu2 %v1417_v41 }
 0x162   :  { %361 = vmatmul.f32.gmra.mxu2 %v1420_v47 }
 0x16a   :  { %364 = vmatmul.f32.gmra.mxu2 %v1423_v49 }
 0x175   :  { %v320_v53 = vpop.f32.mrf.mxu2 }
 0x176   :  { %v321_v54 = vadd.f32 %v320_v53, %v255_v38  ;;  %v279_v38 = vpop.f32.mrf.mxu1 }
 0x178   :  { %v371_v55 = vadd.f32 %v1429_v52, %v321_v54 }
 0x17a   :  { %vm387_vm0 = vcmp.gt.f32.partialorder %v371_v55, 0.0  ;;  %v403_v56 = vmul.f32 0.1, %v371_v55 }
 0x17c   :  { %v419_v57 = vsel %vm387_vm0, %v371_v55, %v403_v56 }
 0x17d   :  { %v323_v58 = vpop.f32.mrf.mxu2  ;;  %484 = vmatmul.f32.vlgmr.msrb.gmra.mxu3 %v419_v57  ;;  %549 = vmatmul.f32.vlgmr.msrb.gmra.mxu0 %v419_v57 }
 0x17e   :  { %v324_v60 = vadd.f32 %v323_v58, %v258_v48  ;;  %v282_v45 = vpop.f32.mrf.mxu1 }
 0x180   :  { %v372_v61 = vadd.f32 %v1429_v52, %v324_v60 }
 0x182   :  { %vm388_vm1 = vcmp.gt.f32.partialorder %v372_v61, 0.0  ;;  %v404_v62 = vmul.f32 0.1, %v372_v61 }
 0x184   :  { %v420_v63 = vsel %vm388_vm1, %v372_v61, %v404_v62 }
 0x185   :  { %v326_v10 = vpop.f32.mrf.mxu2  ;;  %487 = vmatmul.f32.gmra.mxu3 %v420_v63  ;;  %552 = vmatmul.f32.gmra.mxu0 %v420_v63 }
 0x186   :  { %v327_v11 = vadd.f32 %v326_v10, %v261_v50  ;;  %v285_v55 = vpop.f32.mrf.mxu1 }
 0x188   :  { %v373_v13 = vadd.f32 %v1429_v52, %v327_v11 }
 0x18a   :  { %vm389_vm2 = vcmp.gt.f32.partialorder %v373_v13, 0.0  ;;  %v405_v15 = vmul.f32 0.1, %v373_v13 }
 0x18c   :  { %v421_v17 = vsel %vm389_vm2, %v373_v13, %v405_v15 }
 0x18d   :  { %v329_v16 = vpop.f32.mrf.mxu2  ;;  %490 = vmatmul.f32.gmra.mxu3 %v421_v17  ;;  %555 = vmatmul.f32.gmra.mxu0 %v421_v17 }
 0x18e   :  { %v330_v18 = vadd.f32 %v329_v16, %v264_v51  ;;  %v288_v62 = vpop.f32.mrf.mxu1 }
 0x190   :  { %v374_v19 = vadd.f32 %v1429_v52, %v330_v18 }
 0x192   :  { %vm390_vm3 = vcmp.gt.f32.partialorder %v374_v19, 0.0  ;;  %v406_v22 = vmul.f32 0.1, %v374_v19 }
 0x194   :  { %v422_v23 = vsel %vm390_vm3, %v374_v19, %v406_v22 }
 0x195   :  { %v332_v20 = vpop.f32.mrf.mxu2  ;;  %493 = vmatmul.f32.gmra.mxu3 %v422_v23  ;;  %558 = vmatmul.f32.gmra.mxu0 %v422_v23 }
 0x196   :  { %v333_v26 = vadd.f32 %v332_v20, %v267_v59  ;;  %v291_v16 = vpop.f32.mrf.mxu1 }
 0x198   :  { %v375_v27 = vadd.f32 %v1429_v52, %v333_v26 }
 0x19a   :  { %vm391_vm4 = vcmp.gt.f32.partialorder %v375_v27, 0.0  ;;  %v407_v29 = vmul.f32 0.1, %v375_v27 }
 0x19c   :  { %v423_v31 = vsel %vm391_vm4, %v375_v27, %v407_v29 }
 0x19d   :  { %v335_v32 = vpop.f32.mrf.mxu2  ;;  %496 = vmatmul.f32.gmra.mxu3 %v423_v31  ;;  %561 = vmatmul.f32.gmra.mxu0 %v423_v31 }
 0x19e   :  { %v336_v33 = vadd.f32 %v335_v32, %v270_v12  ;;  %v294_v26 = vpop.f32.mrf.mxu1 }
 0x1a0   :  { %v376_v24 = vadd.f32 %v1429_v52, %v336_v33 }
 0x1a2   :  { %vm392_vm5 = vcmp.gt.f32.partialorder %v376_v24, 0.0  ;;  %v408_v35 = vmul.f32 0.1, %v376_v24 }
 0x1a4   :  { %v424_v36 = vsel %vm392_vm5, %v376_v24, %v408_v35 }
 0x1a5   :  { %v338_v37 = vpop.f32.mrf.mxu2  ;;  %499 = vmatmul.f32.gmra.mxu3 %v424_v36  ;;  %564 = vmatmul.f32.gmra.mxu0 %v424_v36 }
 0x1a6   :  { %v339_v39 = vadd.f32 %v338_v37, %v273_v21  ;;  %v297_v24 = vpop.f32.mrf.mxu1 }
 0x1a8   :  { %v377_v40 = vadd.f32 %v1429_v52, %v339_v39 }
 0x1aa   :  { %vm393_vm6 = vcmp.gt.f32.partialorder %v377_v40, 0.0  ;;  %v409_v42 = vmul.f32 0.1, %v377_v40 }
 0x1ac   :  { %v425_v28 = vsel %vm393_vm6, %v377_v40, %v409_v42 }
 0x1ad   :  { %v341_v43 = vpop.f32.mrf.mxu2  ;;  %502 = vmatmul.f32.gmra.mxu3 %v425_v28  ;;  %567 = vmatmul.f32.gmra.mxu0 %v425_v28 }
 0x1ae   :  { %v342_v44 = vadd.f32 %v341_v43, %v276_v30  ;;  %v300_v42 = vpop.f32.mrf.mxu1 }
 0x1b0   :  { %v378_v46 = vadd.f32 %v1429_v52, %v342_v44 }
 0x1b2   :  { %vm394_vm7 = vcmp.gt.f32.partialorder %v378_v46, 0.0  ;;  %v410_v48 = vmul.f32 0.1, %v378_v46 }
 0x1b4   :  { %v426_v50 = vsel %vm394_vm7, %v378_v46, %v410_v48 }
 0x1b5   :  { %v344_v51 = vpop.f32.mrf.mxu2  ;;  %505 = vmatmul.f32.gmra.mxu3 %v426_v50  ;;  %570 = vmatmul.f32.gmra.mxu0 %v426_v50 }
 0x1b6   :  { %v345_v53 = vadd.f32 %v344_v51, %v279_v38 }
 0x1b8   :  { %v379_v54 = vadd.f32 %v1429_v52, %v345_v53 }
 0x1ba   :  { %vm395_vm8 = vcmp.gt.f32.partialorder %v379_v54, 0.0  ;;  %v411_v56 = vmul.f32 0.1, %v379_v54 }
 0x1bc   :  { %v427_v57 = vsel %vm395_vm8, %v379_v54, %v411_v56 }
 0x1bd   :  { %v347_v58 = vpop.f32.mrf.mxu2  ;;  %508 = vmatmul.f32.gmra.mxu3 %v427_v57  ;;  %573 = vmatmul.f32.gmra.mxu0 %v427_v57 }
 0x1be   :  { %v348_v59 = vadd.f32 %v347_v58, %v282_v45 }
 0x1c0   :  { %v380_v60 = vadd.f32 %v1429_v52, %v348_v59 }
 0x1c2   :  { %vm396_vm9 = vcmp.gt.f32.partialorder %v380_v60, 0.0  ;;  %v412_v61 = vmul.f32 0.1, %v380_v60 }
 0x1c4   :  { %v428_v63 = vsel %vm396_vm9, %v380_v60, %v412_v61 }
 0x1c5   :  { %v350_v10 = vpop.f32.mrf.mxu2  ;;  %511 = vmatmul.f32.gmra.mxu3 %v428_v63  ;;  %576 = vmatmul.f32.gmra.mxu0 %v428_v63 }
 0x1c6   :  { %v351_v11 = vadd.f32 %v350_v10, %v285_v55 }
 0x1c8   :  { %v381_v12 = vadd.f32 %v1429_v52, %v351_v11 }
 0x1ca   :  { %vm397_vm10 = vcmp.gt.f32.partialorder %v381_v12, 0.0  ;;  %v413_v13 = vmul.f32 0.1, %v381_v12 }
 0x1cc   :  { %v429_v15 = vsel %vm397_vm10, %v381_v12, %v413_v13  ;;  %v760_v12 = vld [vmem:[#allocation10 + $0xf0] sm:$0xff]  ;;  %v761_v13 = vld [vmem:[#allocation10 + $0xf8] sm:$0xff] }
 0x1cd   :  { %v353_v17 = vpop.f32.mrf.mxu2  ;;  %514 = vmatmul.f32.gmra.mxu3 %v429_v15  ;;  %579 = vmatmul.f32.gmra.mxu0 %v429_v15  ;;  %v751_v15 = vld [vmem:[#allocation10 + $0xa8] sm:$0xff] }
 0x1ce   :  { %v354_v18 = vadd.f32 %v353_v17, %v288_v62  ;;  %763 = vmatpush.msra.mxu2 %v760_v12  ;;  %828 = vmatpush.msra.mxu3 %v761_v13  ;;  %v749_v17 = vld [vmem:[#allocation10 + $0x98] sm:$0xff] }
 0x1d0   :  { %v382_v19 = vadd.f32 %v1429_v52, %v354_v18  ;;  %v747_v18 = vld [vmem:[#allocation10 + $0x88] sm:$0xff] }
 0x1d2   :  { %vm398_vm11 = vcmp.gt.f32.partialorder %v382_v19, 0.0  ;;  %v414_v21 = vmul.f32 0.1, %v382_v19 }
 0x1d4   :  { %v430_v22 = vsel %vm398_vm11, %v382_v19, %v414_v21  ;;  %v744_v19 = vld [vmem:[#allocation10 + $0x70] sm:$0xff]  ;;  %v745_v21 = vld [vmem:[#allocation10 + $0x78] sm:$0xff] }
 0x1d5   :  { %v356_v23 = vpop.f32.mrf.mxu2  ;;  %517 = vmatmul.f32.gmra.mxu3 %v430_v22  ;;  %582 = vmatmul.f32.gmra.mxu0 %v430_v22  ;;  %v742_v22 = vld [vmem:[#allocation10 + $0x60] sm:$0xff] }
 0x1d6   :  { %v357_v20 = vadd.f32 %v356_v23, %v291_v16  ;;  %v746_v16 = vld [vmem:[#allocation10 + $0x80] sm:$0xff]  ;;  %v743_v23 = vld [vmem:[#allocation10 + $0x68] sm:$0xff] }
 0x1d8   :  { %v383_v27 = vadd.f32 %v1429_v52, %v357_v20  ;;  %v741_v20 = vld [vmem:[#allocation10 + $0x58] sm:$0xff] }
 0x1da   :  { %vm399_vm12 = vcmp.gt.f32.partialorder %v383_v27, 0.0  ;;  %v415_v29 = vmul.f32 0.1, %v383_v27 }
 0x1dc   :  { %v431_v30 = vsel %vm399_vm12, %v383_v27, %v415_v29  ;;  %v739_v27 = vld [vmem:[#allocation10 + $0x48] sm:$0xff]  ;;  %v736_v29 = vld [vmem:[#allocation10 + $0x30] sm:$0xff] }
 0x1dd   :  { %v359_v31 = vpop.f32.mrf.mxu2  ;;  %520 = vmatmul.f32.gmra.mxu3 %v431_v30  ;;  %585 = vmatmul.f32.gmra.mxu0 %v431_v30  ;;  %v737_v30 = vld [vmem:[#allocation10 + $0x38] sm:$0xff] }
 0x1de   :  { %v360_v32 = vadd.f32 %v359_v31, %v294_v26  ;;  %v738_v26 = vld [vmem:[#allocation10 + $0x40] sm:$0xff] }
 0x1e0   :  { %v384_v33 = vadd.f32 %v1429_v52, %v360_v32  ;;  %v734_v32 = vld [vmem:[#allocation10 + $0x20] sm:$0xff] }
 0x1e2   :  { %vm400_vm13 = vcmp.gt.f32.partialorder %v384_v33, 0.0  ;;  %v416_v35 = vmul.f32 0.1, %v384_v33 }
 0x1e4   :  { %v432_v36 = vsel %vm400_vm13, %v384_v33, %v416_v35  ;;  %v735_v33 = vld [vmem:[#allocation10 + $0x28] sm:$0xff]  ;;  %v733_v35 = vld [vmem:[#allocation10 + $0x18] sm:$0xff] }
 0x1e5   :  { %v362_v37 = vpop.f32.mrf.mxu2  ;;  %523 = vmatmul.f32.gmra.mxu3 %v432_v36  ;;  %588 = vmatmul.f32.gmra.mxu0 %v432_v36  ;;  %v730_v36 = vld [vmem:[#allocation10] sm:$0xff] }
 0x1e6   :  { %v363_v38 = vadd.f32 %v362_v37, %v297_v24  ;;  %v732_v24 = vld [vmem:[#allocation10 + $0x10] sm:$0xff]  ;;  %v731_v37 = vld [vmem:[#allocation10 + $0x8] sm:$0xff] }
 0x1e8   :  { %v385_v39 = vadd.f32 %v1429_v52, %v363_v38 }
 0x1ea   :  { %vm401_vm14 = vcmp.gt.f32.partialorder %v385_v39, 0.0  ;;  %v417_v40 = vmul.f32 0.1, %v385_v39 }
 0x1ec   :  { %v433_v28 = vsel %vm401_vm14, %v385_v39, %v417_v40  ;;  %v1466_v40 = vld [vmem:[%s1521_s5] ss:$0 sm:$0xff] }
 0x1ed   :  { %v365_v43 = vpop.f32.mrf.mxu2  ;;  %526 = vmatmul.f32.gmra.mxu3 %v433_v28  ;;  %591 = vmatmul.f32.gmra.mxu0 %v433_v28 }
 0x1ee   :  { %v366_v44 = vadd.f32 %v365_v43, %v300_v42 }
 0x1f0   :  { %v386_v45 = vadd.f32 %v1429_v52, %v366_v44 }
 0x1f2   :  { %vm402_vm15 = vcmp.gt.f32.partialorder %v386_v45, 0.0  ;;  %v418_v46 = vmul.f32 0.1, %v386_v45 }
 0x1f4   :  { %v434_v48 = vsel %vm402_vm15, %v386_v45, %v418_v46 }
 0x1f5   :  { %529 = vmatmul.f32.gmra.mxu3 %v434_v48  ;;  %594 = vmatmul.f32.gmra.mxu0 %v434_v48 }
 0x1fa   :  { %v550_v31 = vpop.f32.mrf.mxu0 }
 0x200   :  { %v485_v50 = vpop.f32.mrf.mxu3 }
 0x202   :  { %v553_v38 = vpop.f32.mrf.mxu0 }
 0x208   :  { %v488_v51 = vpop.f32.mrf.mxu3 }
 0x20a   :  { %v556_v39 = vpop.f32.mrf.mxu0 }
 0x210   :  { %v491_v53 = vpop.f32.mrf.mxu3 }
 0x212   :  { %v559_v42 = vpop.f32.mrf.mxu0 }
 0x218   :  { %v494_v54 = vpop.f32.mrf.mxu3 }
 0x220   :  { %v497_v55 = vpop.f32.mrf.mxu3 }
 0x228   :  { %v500_v56 = vpop.f32.mrf.mxu3 }
 0x230   :  { %v503_v57 = vpop.f32.mrf.mxu3 }
 0x238   :  { %v506_v58 = vpop.f32.mrf.mxu3 }
 0x240   :  { %v509_v59 = vpop.f32.mrf.mxu3 }
 0x248   :  { %v512_v60 = vpop.f32.mrf.mxu3 }
 0x250   :  { %v515_v61 = vpop.f32.mrf.mxu3 }
 0x258   :  { %v518_v62 = vpop.f32.mrf.mxu3 }
 0x260   :  { %v521_v63 = vpop.f32.mrf.mxu3 }
 0x268   :  { %v524_v10 = vpop.f32.mrf.mxu3 }
 0x270   :  { %v527_v52 = vpop.f32.mrf.mxu3 }
 0x278   :  { %v530_v11 = vpop.f32.mrf.mxu3 }
 0x279   :  { %598 = vmatpush.msra.mxu1 %v530_v11 }
 0x27b   :  { %599 = vmatpush.msra.mxu1 %v527_v52 }
 0x27d   :  { %600 = vmatpush.msra.mxu1 %v524_v10 }
 0x27f   :  { %601 = vmatpush.msra.mxu1 %v521_v63 }
 0x281   :  { %602 = vmatpush.msra.mxu1 %v518_v62 }
 0x283   :  { %603 = vmatpush.msra.mxu1 %v515_v61 }
 0x285   :  { %604 = vmatpush.msra.mxu1 %v512_v60 }
 0x287   :  { %605 = vmatpush.msra.mxu1 %v509_v59 }
 0x289   :  { %606 = vmatpush.msra.mxu1 %v506_v58 }
 0x28b   :  { %607 = vmatpush.msra.mxu1 %v503_v57 }
 0x28d   :  { %608 = vmatpush.msra.mxu1 %v500_v56 }
 0x28f   :  { %609 = vmatpush.msra.mxu1 %v497_v55 }
 0x291   :  { %610 = vmatpush.msra.mxu1 %v494_v54 }
 0x293   :  { %611 = vmatpush.msra.mxu1 %v491_v53 }
 0x295   :  { %612 = vmatpush.msra.mxu1 %v488_v51  ;;  %v562_v51 = vpop.f32.mrf.mxu0 }
 0x297   :  { %613 = vmatpush.msra.mxu1 %v485_v50 }
 0x298   :  { %614 = vmatmul.f32.vlgmr.msra.gmra.mxu1 %v1365_v0  ;;  %v758_v0 = vld [vmem:[#allocation10 + $0xe0] sm:$0xff] }
 0x299   :  { %764 = vmatpush.msra.mxu2 %v758_v0 }
 0x29d   :  { %v565_v59 = vpop.f32.mrf.mxu0 }
 0x2a0   :  { %617 = vmatmul.f32.gmra.mxu1 %v1369_v1  ;;  %v759_v1 = vld [vmem:[#allocation10 + $0xe8] sm:$0xff] }
 0x2a1   :  { %829 = vmatpush.msra.mxu3 %v759_v1 }
 0x2a5   :  { %v568_v11 = vpop.f32.mrf.mxu0 }
 0x2a8   :  { %620 = vmatmul.f32.gmra.mxu1 %v1373_v2  ;;  %v756_v2 = vld [vmem:[#allocation10 + $0xd0] sm:$0xff] }
 0x2a9   :  { %765 = vmatpush.msra.mxu2 %v756_v2 }
 0x2b0   :  { %623 = vmatmul.f32.gmra.mxu1 %v1377_v3  ;;  %v757_v3 = vld [vmem:[#allocation10 + $0xd8] sm:$0xff] }
 0x2b1   :  { %830 = vmatpush.msra.mxu3 %v757_v3 }
 0x2b8   :  { %626 = vmatmul.f32.gmra.mxu1 %v1381_v4  ;;  %v754_v4 = vld [vmem:[#allocation10 + $0xc0] sm:$0xff] }
 0x2b9   :  { %766 = vmatpush.msra.mxu2 %v754_v4  ;;  %v571_v4 = vpop.f32.mrf.mxu0 }
 0x2c0   :  { %629 = vmatmul.f32.gmra.mxu1 %v1385_v5  ;;  %v755_v5 = vld [vmem:[#allocation10 + $0xc8] sm:$0xff] }
 0x2c1   :  { %831 = vmatpush.msra.mxu3 %v755_v5 }
 0x2c8   :  { %632 = vmatmul.f32.gmra.mxu1 %v1389_v6  ;;  %v752_v6 = vld [vmem:[#allocation10 + $0xb0] sm:$0xff] }
 0x2c9   :  { %767 = vmatpush.msra.mxu2 %v752_v6 }
 0x2d0   :  { %635 = vmatmul.f32.gmra.mxu1 %v1393_v7  ;;  %v753_v7 = vld [vmem:[#allocation10 + $0xb8] sm:$0xff] }
 0x2d1   :  { %832 = vmatpush.msra.mxu3 %v753_v7 }
 0x2d3   :  { %833 = vmatpush.msra.mxu3 %v751_v15 }
 0x2d5   :  { %834 = vmatpush.msra.mxu3 %v749_v17 }
 0x2d7   :  { %835 = vmatpush.msra.mxu3 %v747_v18 }
 0x2d8   :  { %638 = vmatmul.f32.gmra.mxu1 %v1397_v8  ;;  %v750_v8 = vld [vmem:[#allocation10 + $0xa0] sm:$0xff] }
 0x2d9   :  { %768 = vmatpush.msra.mxu2 %v750_v8  ;;  %836 = vmatpush.msra.mxu3 %v745_v21 }
 0x2db   :  { %837 = vmatpush.msra.mxu3 %v743_v23 }
 0x2dd   :  { %838 = vmatpush.msra.mxu3 %v741_v20 }
 0x2df   :  { %839 = vmatpush.msra.mxu3 %v739_v27 }
 0x2e0   :  { %641 = vmatmul.f32.gmra.mxu1 %v1401_v9  ;;  %v748_v9 = vld [vmem:[#allocation10 + $0x90] sm:$0xff] }
 0x2e1   :  { %769 = vmatpush.msra.mxu2 %v748_v9  ;;  %840 = vmatpush.msra.mxu3 %v737_v30 }
 0x2e3   :  { %770 = vmatpush.msra.mxu2 %v746_v16  ;;  %841 = vmatpush.msra.mxu3 %v735_v33  ;;  %v574_v16 = vpop.f32.mrf.mxu0 }
 0x2e5   :  { %771 = vmatpush.msra.mxu2 %v744_v19  ;;  %842 = vmatpush.msra.mxu3 %v733_v35 }
 0x2e7   :  { %772 = vmatpush.msra.mxu2 %v742_v22  ;;  %843 = vmatpush.msra.mxu3 %v731_v37 }
 0x2e8   :  { %644 = vmatmul.f32.gmra.mxu1 %v1405_v14  ;;  %v740_v14 = vld [vmem:[#allocation10 + $0x50] sm:$0xff] }
 0x2e9   :  { %773 = vmatpush.msra.mxu2 %v740_v14 }
 0x2eb   :  { %774 = vmatpush.msra.mxu2 %v738_v26  ;;  %v577_v20 = vpop.f32.mrf.mxu0 }
 0x2ed   :  { %775 = vmatpush.msra.mxu2 %v736_v29 }
 0x2ef   :  { %776 = vmatpush.msra.mxu2 %v734_v32 }
 0x2f0   :  { %647 = vmatmul.f32.gmra.mxu1 %v1409_v25 }
 0x2f1   :  { %777 = vmatpush.msra.mxu2 %v732_v24 }
 0x2f3   :  { %778 = vmatpush.msra.mxu2 %v730_v36  ;;  %v580_v33 = vpop.f32.mrf.mxu0 }
 0x2f8   :  { %650 = vmatmul.f32.gmra.mxu1 %v1413_v34 }
 0x300   :  { %653 = vmatmul.f32.gmra.mxu1 %v1417_v41 }
 0x308   :  { %656 = vmatmul.f32.gmra.mxu1 %v1420_v47 }
 0x310   :  { %659 = vmatmul.f32.gmra.mxu1 %v1423_v49 }
 0x315   :  { %v615_v28 = vpop.f32.mrf.mxu1 }
 0x316   :  { %v616_v43 = vadd.f32 %v615_v28, %v550_v31 }
 0x318   :  { %v666_v44 = vadd.f32 %v1466_v40, %v616_v43 }
 0x31a   :  { %v698_v45 = vmul.f32 0.1, %v666_v44  ;;  %vm682_vm0 = vcmp.gt.f32.partialorder %v666_v44, 0.0 }
 0x31c   :  { %v714_v46 = vsel %vm682_vm0, %v666_v44, %v698_v45 }
 0x31d   :  { %v618_v48 = vpop.f32.mrf.mxu1  ;;  %779 = vmatmul.f32.vlgmr.msra.gmra.mxu2 %v714_v46  ;;  %844 = vmatmul.f32.vlgmr.msra.gmra.mxu3 %v714_v46 }
 0x31e   :  { %v619_v50 = vadd.f32 %v618_v48, %v553_v38 }
 0x320   :  { %v667_v53 = vadd.f32 %v1466_v40, %v619_v50 }
 0x322   :  { %vm683_vm1 = vcmp.gt.f32.partialorder %v667_v53, 0.0  ;;  %v699_v54 = vmul.f32 0.1, %v667_v53 }
 0x324   :  { %v715_v55 = vsel %vm683_vm1, %v667_v53, %v699_v54 }
 0x325   :  { %v621_v56 = vpop.f32.mrf.mxu1  ;;  %782 = vmatmul.f32.gmra.mxu2 %v715_v55  ;;  %847 = vmatmul.f32.gmra.mxu3 %v715_v55 }
 0x326   :  { %v622_v57 = vadd.f32 %v621_v56, %v556_v39 }
 0x328   :  { %v668_v58 = vadd.f32 %v1466_v40, %v622_v57 }
 0x32a   :  { %vm684_vm2 = vcmp.gt.f32.partialorder %v668_v58, 0.0  ;;  %v700_v60 = vmul.f32 0.1, %v668_v58 }
 0x32c   :  { %v716_v61 = vsel %vm684_vm2, %v668_v58, %v700_v60 }
 0x32d   :  { %v624_v62 = vpop.f32.mrf.mxu1  ;;  %785 = vmatmul.f32.gmra.mxu2 %v716_v61  ;;  %850 = vmatmul.f32.gmra.mxu3 %v716_v61 }
 0x32e   :  { %v625_v63 = vadd.f32 %v624_v62, %v559_v42  ;;  %v583_v42 = vpop.f32.mrf.mxu0 }
 0x330   :  { %v669_v10 = vadd.f32 %v1466_v40, %v625_v63 }
 0x332   :  { %vm685_vm3 = vcmp.gt.f32.partialorder %v669_v10, 0.0  ;;  %v701_v52 = vmul.f32 0.1, %v669_v10 }
 0x334   :  { %v717_v12 = vsel %vm685_vm3, %v669_v10, %v701_v52 }
 0x335   :  { %v627_v13 = vpop.f32.mrf.mxu1  ;;  %788 = vmatmul.f32.gmra.mxu2 %v717_v12  ;;  %853 = vmatmul.f32.gmra.mxu3 %v717_v12 }
 0x336   :  { %v628_v0 = vadd.f32 %v627_v13, %v562_v51  ;;  %v586_v51 = vpop.f32.mrf.mxu0 }
 0x338   :  { %v670_v1 = vadd.f32 %v1466_v40, %v628_v0 }
 0x33a   :  { %vm686_vm4 = vcmp.gt.f32.partialorder %v670_v1, 0.0  ;;  %v702_v2 = vmul.f32 0.1, %v670_v1 }
 0x33c   :  { %v718_v3 = vsel %vm686_vm4, %v670_v1, %v702_v2 }
 0x33d   :  { %v630_v5 = vpop.f32.mrf.mxu1  ;;  %791 = vmatmul.f32.gmra.mxu2 %v718_v3  ;;  %856 = vmatmul.f32.gmra.mxu3 %v718_v3 }
 0x33e   :  { %v631_v6 = vadd.f32 %v630_v5, %v565_v59  ;;  %v589_v59 = vpop.f32.mrf.mxu0 }
 0x340   :  { %v671_v7 = vadd.f32 %v1466_v40, %v631_v6 }
 0x342   :  { %vm687_vm5 = vcmp.gt.f32.partialorder %v671_v7, 0.0  ;;  %v703_v8 = vmul.f32 0.1, %v671_v7 }
 0x344   :  { %v719_v15 = vsel %vm687_vm5, %v671_v7, %v703_v8 }
 0x345   :  { %v633_v9 = vpop.f32.mrf.mxu1  ;;  %794 = vmatmul.f32.gmra.mxu2 %v719_v15  ;;  %859 = vmatmul.f32.gmra.mxu3 %v719_v15 }
 0x346   :  { %v634_v17 = vadd.f32 %v633_v9, %v568_v11  ;;  %v592_v11 = vpop.f32.mrf.mxu0 }
 0x348   :  { %v672_v18 = vadd.f32 %v1466_v40, %v634_v17 }
 0x34a   :  { %vm688_vm6 = vcmp.gt.f32.partialorder %v672_v18, 0.0  ;;  %v704_v19 = vmul.f32 0.1, %v672_v18 }
 0x34c   :  { %v720_v21 = vsel %vm688_vm6, %v672_v18, %v704_v19 }
 0x34d   :  { %v636_v22 = vpop.f32.mrf.mxu1  ;;  %797 = vmatmul.f32.gmra.mxu2 %v720_v21  ;;  %862 = vmatmul.f32.gmra.mxu3 %v720_v21 }
 0x34e   :  { %v637_v23 = vadd.f32 %v636_v22, %v571_v4  ;;  %v595_v4 = vpop.f32.mrf.mxu0 }
 0x350   :  { %v673_v14 = vadd.f32 %v1466_v40, %v637_v23 }
 0x352   :  { %vm689_vm7 = vcmp.gt.f32.partialorder %v673_v14, 0.0  ;;  %v705_v26 = vmul.f32 0.1, %v673_v14 }
 0x354   :  { %v721_v27 = vsel %vm689_vm7, %v673_v14, %v705_v26 }
 0x355   :  { %v639_v29 = vpop.f32.mrf.mxu1  ;;  %800 = vmatmul.f32.gmra.mxu2 %v721_v27  ;;  %865 = vmatmul.f32.gmra.mxu3 %v721_v27 }
 0x356   :  { %v640_v30 = vadd.f32 %v639_v29, %v574_v16 }
 0x358   :  { %v674_v31 = vadd.f32 %v1466_v40, %v640_v30 }
 0x35a   :  { %vm690_vm8 = vcmp.gt.f32.partialorder %v674_v31, 0.0  ;;  %v706_v32 = vmul.f32 0.1, %v674_v31 }
 0x35c   :  { %v722_v24 = vsel %vm690_vm8, %v674_v31, %v706_v32  ;;  %v1075_v32 = vld [vmem:[#allocation2] sm:$0xff] }
 0x35d   :  { %v642_v35 = vpop.f32.mrf.mxu1  ;;  %803 = vmatmul.f32.gmra.mxu2 %v722_v24  ;;  %868 = vmatmul.f32.gmra.mxu3 %v722_v24  ;;  %v1077_v24 = vld [vmem:[#allocation2 + $0x10] sm:$0xff] }
 0x35e   :  { %v643_v36 = vadd.f32 %v642_v35, %v577_v20  ;;  %v1078_v35 = vld [vmem:[#allocation2 + $0x18] sm:$0xff] }
 0x360   :  { %v675_v37 = vadd.f32 %v1466_v40, %v643_v36  ;;  %v1079_v36 = vld [vmem:[#allocation2 + $0x20] sm:$0xff] }
 0x362   :  { %vm691_vm9 = vcmp.gt.f32.partialorder %v675_v37, 0.0  ;;  %v707_v38 = vmul.f32 0.1, %v675_v37 }
 0x364   :  { %v723_v39 = vsel %vm691_vm9, %v675_v37, %v707_v38  ;;  %v1080_v37 = vld [vmem:[#allocation2 + $0x28] sm:$0xff]  ;;  %v1081_v38 = vld [vmem:[#allocation2 + $0x30] sm:$0xff] }
 0x365   :  { %v645_v28 = vpop.f32.mrf.mxu1  ;;  %806 = vmatmul.f32.gmra.mxu2 %v723_v39  ;;  %871 = vmatmul.f32.gmra.mxu3 %v723_v39  ;;  %v1082_v39 = vld [vmem:[#allocation2 + $0x38] sm:$0xff] }
 0x366   :  { %v646_v43 = vadd.f32 %v645_v28, %v580_v33  ;;  %v1076_v33 = vld [vmem:[#allocation2 + $0x8] sm:$0xff] }
 0x367   :  { %v1084_v28 = vld [vmem:[#allocation2 + $0x48] sm:$0xff] }
 0x368   :  { %v676_v44 = vadd.f32 %v1466_v40, %v646_v43  ;;  %v1085_v43 = vld [vmem:[#allocation2 + $0x50] sm:$0xff] }
 0x36a   :  { %vm692_vm10 = vcmp.gt.f32.partialorder %v676_v44, 0.0  ;;  %v708_v45 = vmul.f32 0.1, %v676_v44 }
 0x36c   :  { %v724_v46 = vsel %vm692_vm10, %v676_v44, %v708_v45 }
 0x36d   :  { %v648_v48 = vpop.f32.mrf.mxu1  ;;  %809 = vmatmul.f32.gmra.mxu2 %v724_v46  ;;  %874 = vmatmul.f32.gmra.mxu3 %v724_v46 }
 0x36e   :  { %v649_v50 = vadd.f32 %v648_v48, %v583_v42  ;;  %v1083_v42 = vld [vmem:[#allocation2 + $0x40] sm:$0xff] }
 0x36f   :  { %v1492_v48 = vld [vmem:[%s1523_s7] ss:$0 sm:$0xff]  ;;  %s1247_s7 = smov [#allocation11]  }
 0x370   :  { %v677_v53 = vadd.f32 %v1466_v40, %v649_v50  ;;  %s997_s13 = sshll.u32 %s1247_s7, 4  ;;  %s998_s13 = int_to_ptr.vmem [resolvable:$true] %s997_s13 }
 0x372   :  { %vm693_vm11 = vcmp.gt.f32.partialorder %v677_v53, 0.0  ;;  %v709_v54 = vmul.f32 0.1, %v677_v53 }
 0x374   :  { %v725_v55 = vsel %vm693_vm11, %v677_v53, %v709_v54 }
 0x375   :  { %v651_v56 = vpop.f32.mrf.mxu1  ;;  %812 = vmatmul.f32.gmra.mxu2 %v725_v55  ;;  %877 = vmatmul.f32.gmra.mxu3 %v725_v55 }
 0x376   :  { %v652_v57 = vadd.f32 %v651_v56, %v586_v51 }
 0x378   :  { %v678_v58 = vadd.f32 %v1466_v40, %v652_v57 }
 0x37a   :  { %vm694_vm12 = vcmp.gt.f32.partialorder %v678_v58, 0.0  ;;  %v710_v60 = vmul.f32 0.1, %v678_v58 }
 0x37c   :  { %v726_v61 = vsel %vm694_vm12, %v678_v58, %v710_v60 }
 0x37d   :  { %v654_v62 = vpop.f32.mrf.mxu1  ;;  %815 = vmatmul.f32.gmra.mxu2 %v726_v61  ;;  %880 = vmatmul.f32.gmra.mxu3 %v726_v61 }
 0x37e   :  { %v655_v63 = vadd.f32 %v654_v62, %v589_v59 }
 0x380   :  { %v679_v10 = vadd.f32 %v1466_v40, %v655_v63 }
 0x382   :  { %vm695_vm13 = vcmp.gt.f32.partialorder %v679_v10, 0.0  ;;  %v711_v52 = vmul.f32 0.1, %v679_v10 }
 0x384   :  { %v727_v12 = vsel %vm695_vm13, %v679_v10, %v711_v52 }
 0x385   :  { %v657_v13 = vpop.f32.mrf.mxu1  ;;  %818 = vmatmul.f32.gmra.mxu2 %v727_v12  ;;  %883 = vmatmul.f32.gmra.mxu3 %v727_v12 }
 0x386   :  { %v658_v0 = vadd.f32 %v657_v13, %v592_v11 }
 0x388   :  { %v680_v1 = vadd.f32 %v1466_v40, %v658_v0 }
 0x38a   :  { %vm696_vm14 = vcmp.gt.f32.partialorder %v680_v1, 0.0  ;;  %v712_v2 = vmul.f32 0.1, %v680_v1 }
 0x38c   :  { %v728_v3 = vsel %vm696_vm14, %v680_v1, %v712_v2 }
 0x38d   :  { %v660_v5 = vpop.f32.mrf.mxu1  ;;  %821 = vmatmul.f32.gmra.mxu2 %v728_v3  ;;  %886 = vmatmul.f32.gmra.mxu3 %v728_v3 }
 0x38e   :  { %v661_v6 = vadd.f32 %v660_v5, %v595_v4 }
 0x390   :  { %v681_v7 = vadd.f32 %v1466_v40, %v661_v6 }
 0x392   :  { %vm697_vm15 = vcmp.gt.f32.partialorder %v681_v7, 0.0  ;;  %v713_v8 = vmul.f32 0.1, %v681_v7 }
 0x394   :  { %v729_v15 = vsel %vm697_vm15, %v681_v7, %v713_v8 }
 0x395   :  { %824 = vmatmul.f32.gmra.mxu2 %v729_v15  ;;  %889 = vmatmul.f32.gmra.mxu3 %v729_v15 }
 0x3a0   :  { %v780_v9 = vpop.f32.mrf.mxu2  ;;  %v845_v44 = vpop.f32.mrf.mxu3 }
 0x3a8   :  { %v783_v17 = vpop.f32.mrf.mxu2  ;;  %v848_v45 = vpop.f32.mrf.mxu3 }
 0x3b0   :  { %v786_v16 = vpop.f32.mrf.mxu2  ;;  %v851_v46 = vpop.f32.mrf.mxu3 }
 0x3b8   :  { %v789_v18 = vpop.f32.mrf.mxu2  ;;  %v854_v50 = vpop.f32.mrf.mxu3 }
 0x3c0   :  { %v792_v19 = vpop.f32.mrf.mxu2 }
 0x3c8   :  { %v795_v21 = vpop.f32.mrf.mxu2 }
 0x3d0   :  { %v798_v22 = vpop.f32.mrf.mxu2 }
 0x3d8   :  { %v801_v23 = vpop.f32.mrf.mxu2 }
 0x3e0   :  { %v804_v14 = vpop.f32.mrf.mxu2 }
 0x3e8   :  { %v807_v20 = vpop.f32.mrf.mxu2 }
 0x3f0   :  { %v810_v26 = vpop.f32.mrf.mxu2 }
 0x3f8   :  { %v813_v27 = vpop.f32.mrf.mxu2 }
 0x400   :  { %v816_v29 = vpop.f32.mrf.mxu2 }
 0x408   :  { %v819_v30 = vpop.f32.mrf.mxu2 }
 0x410   :  { %v822_v40 = vpop.f32.mrf.mxu2 }
 0x418   :  { %v825_v31 = vpop.f32.mrf.mxu2 }
 0x419   :  { %893 = vmatpush.msra.mxu0 %v825_v31 }
 0x41b   :  { %894 = vmatpush.msra.mxu0 %v822_v40 }
 0x41d   :  { %895 = vmatpush.msra.mxu0 %v819_v30 }
 0x41f   :  { %896 = vmatpush.msra.mxu0 %v816_v29 }
 0x421   :  { %897 = vmatpush.msra.mxu0 %v813_v27 }
 0x423   :  { %898 = vmatpush.msra.mxu0 %v810_v26 }
 0x425   :  { %899 = vmatpush.msra.mxu0 %v807_v20 }
 0x427   :  { %900 = vmatpush.msra.mxu0 %v804_v14 }
 0x429   :  { %901 = vmatpush.msra.mxu0 %v801_v23 }
 0x42b   :  { %902 = vmatpush.msra.mxu0 %v798_v22 }
 0x42d   :  { %903 = vmatpush.msra.mxu0 %v795_v21 }
 0x42f   :  { %904 = vmatpush.msra.mxu0 %v792_v19 }
 0x431   :  { %905 = vmatpush.msra.mxu0 %v789_v18 }
 0x433   :  { %906 = vmatpush.msra.mxu0 %v786_v16 }
 0x435   :  { %907 = vmatpush.msra.mxu0 %v783_v17 }
 0x437   :  { %908 = vmatpush.msra.mxu0 %v780_v9 }
 0x438   :  { %909 = vmatmul.f32.vlgmr.msra.gmra.mxu0 %v1075_v32 }
 0x440   :  { %912 = vmatmul.f32.gmra.mxu0 %v1076_v33 }
 0x448   :  { %915 = vmatmul.f32.gmra.mxu0 %v1077_v24 }
 0x450   :  { %918 = vmatmul.f32.gmra.mxu0 %v1078_v35 }
 0x458   :  { %921 = vmatmul.f32.gmra.mxu0 %v1079_v36 }
 0x460   :  { %924 = vmatmul.f32.gmra.mxu0 %v1080_v37 }
 0x468   :  { %927 = vmatmul.f32.gmra.mxu0 %v1081_v38 }
 0x470   :  { %930 = vmatmul.f32.gmra.mxu0 %v1082_v39 }
 0x478   :  { %933 = vmatmul.f32.gmra.mxu0 %v1083_v42 }
 0x480   :  { %936 = vmatmul.f32.gmra.mxu0 %v1084_v28 }
 0x488   :  { %939 = vmatmul.f32.gmra.mxu0 %v1085_v43 }
 0x490   :  { %942 = vmatmul.f32.gmra.mxu0 %v1409_v25 }
 0x498   :  { %945 = vmatmul.f32.gmra.mxu0 %v1413_v34 }
 0x4a0   :  { %948 = vmatmul.f32.gmra.mxu0 %v1417_v41  ;;  %v857_v41 = vpop.f32.mrf.mxu3 }
 0x4a8   :  { %951 = vmatmul.f32.gmra.mxu0 %v1420_v47  ;;  %v860_v57 = vpop.f32.mrf.mxu3 }
 0x4b0   :  { %954 = vmatmul.f32.gmra.mxu0 %v1423_v49  ;;  %v863_v61 = vpop.f32.mrf.mxu3 }
 0x4b5   :  { %v910_v51 = vpop.f32.mrf.mxu0 }
 0x4b6   :  { %v911_v53 = vadd.f32 %v910_v51, %v845_v44 }
 0x4b8   :  { %v961_v25 = vadd.f32 %v1492_v48, %v911_v53  ;;  %v866_v52 = vpop.f32.mrf.mxu3 }
 0x4ba   :  { %977 = vst [vmem:[#allocation11] sm:$0xff] %v961_v25 }
 0x4bd   :  { %v913_v34 = vpop.f32.mrf.mxu0 }
 0x4be   :  { %v914_v54 = vadd.f32 %v913_v34, %v848_v45 }
 0x4c0   :  { %v962_v55 = vadd.f32 %v1492_v48, %v914_v54  ;;  %v869_v2 = vpop.f32.mrf.mxu3 }
 0x4c2   :  { %978 = vst [vmem:[#allocation11 + $0x8] sm:$0xff] %v962_v55 }
 0x4c5   :  { %v916_v47 = vpop.f32.mrf.mxu0 }
 0x4c6   :  { %v917_v56 = vadd.f32 %v916_v47, %v851_v46 }
 0x4c8   :  { %v963_v49 = vadd.f32 %v1492_v48, %v917_v56  ;;  %v872_v7 = vpop.f32.mrf.mxu3 }
 0x4ca   :  { %979 = vst [vmem:[#allocation11 + $0x10] sm:$0xff] %v963_v49 }
 0x4cd   :  { %v919_v58 = vpop.f32.mrf.mxu0 }
 0x4ce   :  { %v920_v59 = vadd.f32 %v919_v58, %v854_v50 }
 0x4d0   :  { %v964_v60 = vadd.f32 %v1492_v48, %v920_v59  ;;  %v875_v17 = vpop.f32.mrf.mxu3 }
 0x4d2   :  { %980 = vst [vmem:[#allocation11 + $0x18] sm:$0xff] %v964_v60 }
 0x4d5   :  { %v922_v62 = vpop.f32.mrf.mxu0 }
 0x4d6   :  { %v923_v63 = vadd.f32 %v922_v62, %v857_v41 }
 0x4d8   :  { %v965_v10 = vadd.f32 %v1492_v48, %v923_v63  ;;  %v878_v21 = vpop.f32.mrf.mxu3 }
 0x4da   :  { %981 = vst [vmem:[#allocation11 + $0x20] sm:$0xff] %v965_v10 }
 0x4dd   :  { %v925_v11 = vpop.f32.mrf.mxu0 }
 0x4de   :  { %v926_v12 = vadd.f32 %v925_v11, %v860_v57 }
 0x4e0   :  { %v966_v13 = vadd.f32 %v1492_v48, %v926_v12  ;;  %v881_v27 = vpop.f32.mrf.mxu3 }
 0x4e2   :  { %982 = vst [vmem:[#allocation11 + $0x28] sm:$0xff] %v966_v13 }
 0x4e5   :  { %v928_v0 = vpop.f32.mrf.mxu0 }
 0x4e6   :  { %v929_v1 = vadd.f32 %v928_v0, %v863_v61 }
 0x4e8   :  { %v967_v3 = vadd.f32 %v1492_v48, %v929_v1  ;;  %v884_v32 = vpop.f32.mrf.mxu3 }
 0x4ea   :  { %983 = vst [vmem:[#allocation11 + $0x30] sm:$0xff] %v967_v3 }
 0x4ed   :  { %v931_v4 = vpop.f32.mrf.mxu0 }
 0x4ee   :  { %v932_v5 = vadd.f32 %v931_v4, %v866_v52 }
 0x4f0   :  { %v968_v6 = vadd.f32 %v1492_v48, %v932_v5  ;;  %v887_v36 = vpop.f32.mrf.mxu3 }
 0x4f2   :  { %984 = vst [vmem:[#allocation11 + $0x38] sm:$0xff] %v968_v6 }
 0x4f5   :  { %v934_v8 = vpop.f32.mrf.mxu0 }
 0x4f6   :  { %v935_v15 = vadd.f32 %v934_v8, %v869_v2 }
 0x4f8   :  { %v969_v9 = vadd.f32 %v1492_v48, %v935_v15  ;;  %v890_v42 = vpop.f32.mrf.mxu3 }
 0x4fa   :  { %985 = vst [vmem:[#allocation11 + $0x40] sm:$0xff] %v969_v9 }
 0x4fd   :  { %v937_v16 = vpop.f32.mrf.mxu0 }
 0x4fe   :  { %v938_v18 = vadd.f32 %v937_v16, %v872_v7 }
 0x500   :  { %v970_v19 = vadd.f32 %v1492_v48, %v938_v18 }
 0x502   :  { %986 = vst [vmem:[#allocation11 + $0x48] sm:$0xff] %v970_v19 }
 0x505   :  { %v940_v22 = vpop.f32.mrf.mxu0 }
 0x506   :  { %v941_v23 = vadd.f32 %v940_v22, %v875_v17 }
 0x508   :  { %v971_v14 = vadd.f32 %v1492_v48, %v941_v23 }
 0x50a   :  { %987 = vst [vmem:[#allocation11 + $0x50] sm:$0xff] %v971_v14 }
 0x50d   :  { %v943_v20 = vpop.f32.mrf.mxu0 }
 0x50e   :  { %v944_v26 = vadd.f32 %v943_v20, %v878_v21 }
 0x510   :  { %v972_v29 = vadd.f32 %v1492_v48, %v944_v26 }
 0x512   :  { %988 = vst [vmem:[#allocation11 + $0x58] sm:$0xff] %v972_v29 }
 0x515   :  { %v946_v30 = vpop.f32.mrf.mxu0 }
 0x516   :  { %v947_v40 = vadd.f32 %v946_v30, %v881_v27 }
 0x518   :  { %v973_v31 = vadd.f32 %v1492_v48, %v947_v40 }
 0x51a   :  { %989 = vst [vmem:[#allocation11 + $0x60] sm:$0xff] %v973_v31 }
 0x51d   :  { %v949_v33 = vpop.f32.mrf.mxu0 }
 0x51e   :  { %v950_v24 = vadd.f32 %v949_v33, %v884_v32 }
 0x520   :  { %v974_v35 = vadd.f32 %v1492_v48, %v950_v24 }
 0x522   :  { %990 = vst [vmem:[#allocation11 + $0x68] sm:$0xff] %v974_v35 }
 0x525   :  { %v952_v37 = vpop.f32.mrf.mxu0 }
 0x526   :  { %v953_v38 = vadd.f32 %v952_v37, %v887_v36 }
 0x528   :  { %v975_v39 = vadd.f32 %v1492_v48, %v953_v38 }
 0x52a   :  { %991 = vst [vmem:[#allocation11 + $0x70] sm:$0xff] %v975_v39 }
 0x52d   :  { %v955_v28 = vpop.f32.mrf.mxu0 }
 0x52e   :  { %v956_v43 = vadd.f32 %v955_v28, %v890_v42 }
 0x530   :  { %v976_v44 = vadd.f32 %v1492_v48, %v956_v43 }
 0x532   :  { %992 = vst [vmem:[#allocation11 + $0x78] sm:$0xff] %v976_v44 }
 0x533   :  { %1005 = dma.vmem_to_hbm [thread:$0]  %s998_s13, 2048, %s1000_s16, [#allocation4], %s1239_s10, %s1239_s10, %s1240_s11  }
 0x534   :  { %1236 = dma.done.wait [#allocation4], 2048  }
 0x535   :  { %1237 = vsyncadd [#allocation4], 4294965248 }
 0x536   :  { %1010 = vsyncpa [#allocation3], 1 }
 0x537   :  { %1011 = vsyncpa [#allocation6], 1 }
 0x538   :  { %1012 = vsyncpa [#allocation9], 1 }
 0x539   :  { %1013 = vsyncpa [#allocation4], 1 }

</bundles_post_ra>
